<compile_context>
chip_gen: v7x
topology: tpu7x:2x2x1
jax: 0.10.0
libtpu: 0.0.40
codegen_flags: <defaults>
</compile_context>

<pallas_src>
import jax
import jax.numpy as jnp
from jax import lax
from jax.experimental import pallas as pl
from jax.experimental.pallas import tpu as pltpu


# ---------------------------------------------------------------------------
# Generation-aware VMEM budgets.
# ---------------------------------------------------------------------------
def _vmem_capacity_bytes():
    try:
        info = pltpu.get_tpu_info()
        cap = getattr(info, "vmem_capacity_bytes", None)
        if cap:
            return int(cap)
    except Exception:
        pass
    return 64 * 1024 * 1024          # conservative fallback (v7x per-TC VMEM)


def _round_up(x, m):
    return (x + m - 1) // m * m


# ---------------------------------------------------------------------------
# Pass 1: 3x3 conv (deep-K im2col for small Cin, per-tap accumulating matmuls
# for Cin >= 128) + per-tile batch statistics (sum, centered M2).
# ---------------------------------------------------------------------------
def _conv3x3_kernel(xa_ref, xb0_ref, xb1_ref, w_ref, y_ref, stats_ref):
    """One (batch element, row tile) grid step.

    xa_ref    : (1, TH, W+2, Cin)   padded-input rows [t*TH, t*TH+TH)
    xb0_ref   : (1, 1,  W+2, Cin)   padded-input row   t*TH+TH      (halo)
    xb1_ref   : (1, 1,  W+2, Cin)   padded-input row   t*TH+TH+1    (halo)
    w_ref     : (9*Cin, Cp)         weights, (kh, kw, ci) order, Cout padded
    y_ref     : (1, TH*W, Cp)       conv output tile (store dtype)
    stats_ref : (1, 1, 2, Cp)       per-tile [channel sum, centered M2]
    """
    TH = xa_ref.shape[1]
    Wp = xa_ref.shape[2]
    Cin = xa_ref.shape[3]
    Wt = Wp - 2
    Cp = y_ref.shape[2]
    M = TH * Wt

    # Halo window for this row tile: (TH+2, W+2, Cin).  Leading-axis concat.
    xw = jnp.concatenate([xa_ref[0], xb0_ref[0], xb1_ref[0]], axis=0)

    if Cin >= 128:
        # K = Cin already fills the MXU contraction: 9 accumulating matmuls on
        # shifted windows, no 9x patch materialization (MRB-accumulated on v7x).
        acc = None
        for kh in range(3):
            for kw in range(3):
                tap = xw[kh:kh + TH, kw:kw + Wt, :].reshape(M, Cin)
                k0 = (kh * 3 + kw) * Cin
                part = jnp.dot(tap, w_ref[k0:k0 + Cin, :],
                               preferred_element_type=jnp.float32)
                acc = part if acc is None else acc + part
    else:
        # Small Cin: build the im2col patch once -> single deep-K MXU matmul.
        taps = [xw[kh:kh + TH, kw:kw + Wt, :]
                for kh in range(3) for kw in range(3)]
        patch = jnp.concatenate(taps, axis=-1).reshape(M, 9 * Cin)  # (M, 9*Cin)
        acc = jnp.dot(patch, w_ref[...],
                      preferred_element_type=jnp.float32)           # (M, Cp)

    # Per-tile BN partials in f32 from the in-register accumulator:
    # channel sum and centered second moment (no sumsq cancellation).
    s = jnp.sum(acc, axis=0, keepdims=True)                          # (1, Cp)
    d = acc - s * (1.0 / M)
    m2 = jnp.sum(d * d, axis=0, keepdims=True)                       # (1, Cp)
    stats_ref[...] = jnp.concatenate([s, m2], axis=0).reshape(1, 1, 2, Cp)

    y_ref[...] = acc.astype(y_ref.dtype).reshape(1, M, Cp)


# ---------------------------------------------------------------------------
# Pass 2: BN affine + ReLU + channels-to-front transpose, writing the
# NCHW-contiguous layout directly (no separate XLA transpose pass).
# ---------------------------------------------------------------------------
def _bn_relu_nchw_kernel(y_ref, scale_ref, shift_ref, o_ref):
    """y_ref: (1, TM, Cp) store dtype; scale/shift: (1, Cp) f32;
    o_ref: (1, Cout, TM) f32 — a tile of the (N, Cout, H*W) output."""
    cout = o_ref.shape[1]
    y = y_ref[0].astype(jnp.float32)                                 # (TM, Cp)
    z = jnp.maximum(y * scale_ref[...] + shift_ref[...], 0.0)        # (TM, Cp)
    zt = jnp.transpose(z, (1, 0))                                    # (Cp, TM)
    o_ref[0] = zt[:cout, :]


# ---------------------------------------------------------------------------
# Tile-size choosers (largest tile fitting the budget, preferring MXU-aligned
# M and a grid with >= 2 steps for megacore).
# ---------------------------------------------------------------------------
def _choose_row_tile(N, H, W, Cin, Cp, in_isz, st_isz, budget_bytes):
    cands = [th for th in range(H, 0, -1)
             if H % th == 0 and (th % 8 == 0 or th == H)]

    def footprint(th):
        m = th * W
        halo = 2 * (th + 2) * (W + 2) * Cin * in_isz     # input blocks, x2 buf
        wgt = 2 * 9 * Cin * Cp * in_isz                  # weight block, x2 buf
        yout = 2 * m * Cp * st_isz                       # conv out tile, x2 buf
        stats = 2 * 2 * Cp * 4
        xw = (th + 2) * (W + 2) * Cin * in_isz           # in-kernel halo concat
        accb = m * Cp * 4                                # f32 accumulator
        if Cin >= 128:
            temps = xw + accb + m * Cin * in_isz         # one tap at a time
        else:
            temps = xw + accb + m * 9 * Cin * in_isz     # im2col patch
        return halo + wgt + yout + stats + temps

    feasible = [th for th in cands if footprint(th) <= budget_bytes]
    if not feasible:
        feasible = [cands[-1]]

    def pref(th):
        m = th * W
        return (N * (H // th) >= 2, m % 256 == 0, m % 128 == 0, m)

    return max(feasible, key=pref)


def _choose_bn_tile(N, HW, Cp, Cout, st_isz, budget_bytes):
    cands = [t for t in range(HW, 0, -1)
             if HW % t == 0 and (t % 8 == 0 or t == HW)]

    def footprint(t):
        return (2 * t * Cp * st_isz          # input tile, x2 buf
                + 2 * Cout * t * 4           # output tile, x2 buf
                + 3 * t * Cp * 4)            # f32 affine / transpose temps

    feasible = [t for t in cands if footprint(t) <= budget_bytes]
    if not feasible:
        feasible = [cands[-1]]

    def pref(t):
        return (N * (HW // t) >= 2, t % 128 == 0, t % 8 == 0, t)

    return max(feasible, key=pref)


# ---------------------------------------------------------------------------
# Wrapper: matches the PyTorch module's NCHW contract.
# ---------------------------------------------------------------------------
def conv3x3_bn_relu(x_nchw, w_oihw, gamma, beta, eps=1e-5,
                    compute_dtype=jnp.bfloat16, row_tile=None):
    N, Cin, H, W = x_nchw.shape
    Cout = w_oihw.shape[0]
    Cp = _round_up(Cout, 128)            # lane-dense conv store / MXU N-dim

    cap = _vmem_capacity_bytes()
    vmem_limit = max(32 << 20, min(int(0.75 * cap), 100 << 20))
    budget = max(4 << 20, min(int(0.40 * cap), 56 << 20))

    # Single XLA producer pass: NCHW->NHWC transpose + 1-px halo pad + cast.
    # TODO(synk): if W % 8 != 0, pad W here so the in-kernel (TH,W,*)->(TH*W,*)
    #             merge stays a free reshape.
    x_nhwc = jnp.transpose(x_nchw, (0, 2, 3, 1)).astype(compute_dtype)
    x_pad = jnp.pad(x_nhwc, ((0, 0), (1, 1), (1, 1), (0, 0)))   # (N, H+2, W+2, Cin)
    # OIHW -> (kh, kw, ci) x cout, zero-padded to Cp output lanes.
    w_mat = jnp.transpose(w_oihw, (2, 3, 1, 0)).reshape(9 * Cin, Cout)
    w_mat = jnp.pad(w_mat, ((0, 0), (0, Cp - Cout))).astype(compute_dtype)

    in_isz = jnp.dtype(compute_dtype).itemsize
    store_dtype = compute_dtype          # bf16 intermediate halves epilogue HBM
    st_isz = jnp.dtype(store_dtype).itemsize

    TH = row_tile if row_tile is not None else _choose_row_tile(
        N, H, W, Cin, Cp, in_isz, st_isz, budget)
    assert H % TH == 0 and (TH % 8 == 0 or TH == H), (H, TH)
    HT = H // TH
    M = TH * W

    conv_call = pl.pallas_call(
        _conv3x3_kernel,
        out_shape=(
            jax.ShapeDtypeStruct((N, H * W, Cp), store_dtype),
            jax.ShapeDtypeStruct((N, HT, 2, Cp), jnp.float32),
        ),
        grid_spec=pltpu.PrefetchScalarGridSpec(
            num_scalar_prefetch=0,
            grid=(N, HT),
            in_specs=[
                # main TH rows of the halo'd row tile
                pl.BlockSpec((1, TH, W + 2, Cin), lambda n, t: (n, t, 0, 0)),
                # two bottom-halo rows (1-row blocks)
                pl.BlockSpec((1, 1, W + 2, Cin),
                             lambda n, t: (n, (t + 1) * TH, 0, 0)),
                pl.BlockSpec((1, 1, W + 2, Cin),
                             lambda n, t: (n, (t + 1) * TH + 1, 0, 0)),
                # flattened weights, constant block (re-fetched by pipeline)
                pl.BlockSpec((9 * Cin, Cp), lambda n, t: (0, 0)),
            ],
            out_specs=[
                pl.BlockSpec((1, M, Cp), lambda n, t: (n, t, 0)),
                pl.BlockSpec((1, 1, 2, Cp), lambda n, t: (n, t, 0, 0)),
            ],
        ),
        compiler_params=pltpu.CompilerParams(
            # No resident accumulator -> both axes parallel (megacore-safe).
            dimension_semantics=("parallel", "parallel"),
            vmem_limit_bytes=vmem_limit,
        ),
    )
    y_conv, stats = conv_call(x_pad, x_pad, x_pad, w_mat)

    # Training-mode BatchNorm statistics via Chan's parallel-variance combine
    # of per-tile (sum, centered M2) — numerically stable, parallel-grid safe.
    count = float(N * H * W)
    sum_i = stats[:, :, 0, :Cout]                   # (N, HT, Cout)
    m2_i = stats[:, :, 1, :Cout]                    # (N, HT, Cout)
    mean_i = sum_i / float(M)
    mean = jnp.sum(sum_i, axis=(0, 1)) / count
    m2 = (jnp.sum(m2_i, axis=(0, 1))
          + float(M) * jnp.sum((mean_i - mean) ** 2, axis=(0, 1)))
    var = jnp.maximum(m2 / count, 0.0)              # biased variance
    scale = gamma.astype(jnp.float32) * lax.rsqrt(var + eps)
    shift = beta.astype(jnp.float32) - mean * scale
    scale_p = jnp.pad(scale, (0, Cp - Cout)).reshape(1, Cp)
    shift_p = jnp.pad(shift, (0, Cp - Cout)).reshape(1, Cp)

    # Pass 2: BN + ReLU + transpose, emitting NCHW-contiguous (N, Cout, H*W).
    HW = H * W
    TM = _choose_bn_tile(N, HW, Cp, Cout, st_isz, budget)
    bn_call = pl.pallas_call(
        _bn_relu_nchw_kernel,
        out_shape=jax.ShapeDtypeStruct((N, Cout, HW), jnp.float32),
        grid_spec=pltpu.PrefetchScalarGridSpec(
            num_scalar_prefetch=0,
            grid=(N, HW // TM),
            in_specs=[
                pl.BlockSpec((1, TM, Cp), lambda n, t: (n, t, 0)),
                pl.BlockSpec((1, Cp), lambda n, t: (0, 0)),
                pl.BlockSpec((1, Cp), lambda n, t: (0, 0)),
            ],
            out_specs=pl.BlockSpec((1, Cout, TM), lambda n, t: (n, 0, t)),
        ),
        compiler_params=pltpu.CompilerParams(
            dimension_semantics=("parallel", "parallel"),
            vmem_limit_bytes=vmem_limit,
        ),
    )
    out = bn_call(y_conv, scale_p, shift_p)

    # Free contiguous split of the trailing dim — no data movement.
    return out.reshape(N, Cout, H, W)


# ---------------------------------------------------------------------------
# Pure-JAX reference (PyTorch semantics, f32).
# ---------------------------------------------------------------------------
def _reference(x_nchw, w_oihw, gamma, beta, eps=1e-5):
    conv = lax.conv_general_dilated(
        x_nchw, w_oihw, window_strides=(1, 1), padding="SAME",
        dimension_numbers=("NCHW", "OIHW", "NCHW"))
    mean = conv.mean(axis=(0, 2, 3))
    var = conv.var(axis=(0, 2, 3))
    norm = (conv - mean[None, :, None, None]) * lax.rsqrt(
        var + eps)[None, :, None, None]
    return jnp.maximum(norm * gamma[None, :, None, None]
                       + beta[None, :, None, None], 0.0)


if __name__ == "__main__":
    key = jax.random.PRNGKey(0)
    k_x, k_w = jax.random.split(key)

    N, Cin, Cout, H, W = 2, 4, 8, 16, 16
    x = jax.random.normal(k_x, (N, Cin, H, W), dtype=jnp.float32)
    # Conv2d weight (out_channels, in_channels, 3, 3), bias=False.
    w = jax.random.normal(k_w, (Cout, Cin, 3, 3), dtype=jnp.float32) * 0.1
    # SyncBatchNorm default affine parameters.
    gamma = jnp.ones((Cout,), jnp.float32)
    beta = jnp.zeros((Cout,), jnp.float32)

    ref = _reference(x, w, gamma, beta)

    # f32-matmul path with an explicit multi-row-tile grid (exercises the halo
    # tiling and the parallel variance combine); tight tolerance vs. f32 ref.
    out_f32 = jax.block_until_ready(
        conv3x3_bn_relu(x, w, gamma, beta,
                        compute_dtype=jnp.float32, row_tile=8))
    assert out_f32.shape == (N, Cout, H, W)
    err_f32 = float(jnp.max(jnp.abs(out_f32 - ref)))
    assert err_f32 < 5e-4, err_f32

    # Default bf16-MXU path (bf16 intermediate store, f32 accumulation and BN
    # math), auto row tile.
    out_bf16 = jax.block_until_ready(conv3x3_bn_relu(x, w, gamma, beta))
    assert out_bf16.shape == (N, Cout, H, W)
    err_bf16 = float(jnp.max(jnp.abs(out_bf16 - ref)))
    assert err_bf16 < 5e-2, err_bf16

    print("KERNEL_OK")
</pallas_src>

<mosaic_0001>
module attributes {stable_mosaic.version = 11 : i64} {
  func.func @_conv3x3_kernel(%arg0: i32, %arg1: i32, %arg2: memref<1x8x18x4xf32, #tpu.memory_space<vmem>>, %arg3: memref<1x1x18x4xf32, #tpu.memory_space<vmem>>, %arg4: memref<1x1x18x4xf32, #tpu.memory_space<vmem>>, %arg5: memref<36x128xf32, #tpu.memory_space<vmem>>, %arg6: memref<1x128x128xf32, #tpu.memory_space<vmem>>, %arg7: memref<1x1x2x128xf32, #tpu.memory_space<vmem>>) attributes {dimension_semantics = [#tpu.dimension_semantics<parallel>, #tpu.dimension_semantics<parallel>], iteration_bounds = array<i64: 2, 2>, scalar_prefetch = 0 : i64, scratch_operands = 0 : i64, tpu.core_type = #tpu.core_type<tc>, window_params = [{transform_indices = @transform_0, window_bounds = array<i64: 1, 8, 18, 4>}, {transform_indices = @transform_1, window_bounds = array<i64: 1, 1, 18, 4>}, {transform_indices = @transform_2, window_bounds = array<i64: 1, 1, 18, 4>}, {pipeline_mode = #tpu.pipeline_mode<synchronous>, transform_indices = @transform_3, window_bounds = array<i64: 36, 128>}, {transform_indices = @transform_4, window_bounds = array<i64: 1, 128, 128>}, {transform_indices = @transform_5, window_bounds = array<i64: 1, 1, 2, 128>}]} {
    %c0 = arith.constant 0 : index
    %c0_0 = arith.constant 0 : index
    %c0_1 = arith.constant 0 : index
    %c0_2 = arith.constant 0 : index
    %0 = vector.load %arg2[%c0, %c0_0, %c0_1, %c0_2] : memref<1x8x18x4xf32, #tpu.memory_space<vmem>>, vector<1x8x18x4xf32>
    %1 = vector.shape_cast %0 : vector<1x8x18x4xf32> to vector<8x18x4xf32>
    %c0_3 = arith.constant 0 : index
    %c0_4 = arith.constant 0 : index
    %c0_5 = arith.constant 0 : index
    %c0_6 = arith.constant 0 : index
    %2 = vector.load %arg3[%c0_3, %c0_4, %c0_5, %c0_6] : memref<1x1x18x4xf32, #tpu.memory_space<vmem>>, vector<1x1x18x4xf32>
    %3 = vector.shape_cast %2 : vector<1x1x18x4xf32> to vector<1x18x4xf32>
    %c0_7 = arith.constant 0 : index
    %c0_8 = arith.constant 0 : index
    %c0_9 = arith.constant 0 : index
    %c0_10 = arith.constant 0 : index
    %4 = vector.load %arg4[%c0_7, %c0_8, %c0_9, %c0_10] : memref<1x1x18x4xf32, #tpu.memory_space<vmem>>, vector<1x1x18x4xf32>
    %5 = vector.shape_cast %4 : vector<1x1x18x4xf32> to vector<1x18x4xf32>
    %6 = tpu.concatenate %1, %3, %5 in 0 : vector<8x18x4xf32>, vector<1x18x4xf32>, vector<1x18x4xf32> -> vector<10x18x4xf32>
    %7 = vector.extract_strided_slice %6 {offsets = [0, 0, 0], sizes = [8, 16, 4], strides = [1, 1, 1]} : vector<10x18x4xf32> to vector<8x16x4xf32>
    %8 = vector.extract_strided_slice %6 {offsets = [0, 1, 0], sizes = [8, 16, 4], strides = [1, 1, 1]} : vector<10x18x4xf32> to vector<8x16x4xf32>
    %9 = vector.extract_strided_slice %6 {offsets = [0, 2, 0], sizes = [8, 16, 4], strides = [1, 1, 1]} : vector<10x18x4xf32> to vector<8x16x4xf32>
    %10 = vector.extract_strided_slice %6 {offsets = [1, 0, 0], sizes = [8, 16, 4], strides = [1, 1, 1]} : vector<10x18x4xf32> to vector<8x16x4xf32>
    %11 = vector.extract_strided_slice %6 {offsets = [1, 1, 0], sizes = [8, 16, 4], strides = [1, 1, 1]} : vector<10x18x4xf32> to vector<8x16x4xf32>
    %12 = vector.extract_strided_slice %6 {offsets = [1, 2, 0], sizes = [8, 16, 4], strides = [1, 1, 1]} : vector<10x18x4xf32> to vector<8x16x4xf32>
    %13 = vector.extract_strided_slice %6 {offsets = [2, 0, 0], sizes = [8, 16, 4], strides = [1, 1, 1]} : vector<10x18x4xf32> to vector<8x16x4xf32>
    %14 = vector.extract_strided_slice %6 {offsets = [2, 1, 0], sizes = [8, 16, 4], strides = [1, 1, 1]} : vector<10x18x4xf32> to vector<8x16x4xf32>
    %15 = vector.extract_strided_slice %6 {offsets = [2, 2, 0], sizes = [8, 16, 4], strides = [1, 1, 1]} : vector<10x18x4xf32> to vector<8x16x4xf32>
    %16 = tpu.concatenate %7, %8, %9, %10, %11, %12, %13, %14, %15 in 2 : vector<8x16x4xf32>, vector<8x16x4xf32>, vector<8x16x4xf32>, vector<8x16x4xf32>, vector<8x16x4xf32>, vector<8x16x4xf32>, vector<8x16x4xf32>, vector<8x16x4xf32>, vector<8x16x4xf32> -> vector<8x16x36xf32>
    %17 = vector.shape_cast %16 : vector<8x16x36xf32> to vector<128x36xf32>
    %c0_11 = arith.constant 0 : index
    %c0_12 = arith.constant 0 : index
    %18 = vector.load %arg5[%c0_11, %c0_12] : memref<36x128xf32, #tpu.memory_space<vmem>>, vector<36x128xf32>
    %cst = arith.constant dense<0.000000e+00> : vector<128x128xf32>
    %19 = tpu.matmul %17, %18, %cst {dimension_numbers = #tpu.dot_dimension_numbers<[1], [0], [0], [1], [0, 0, 1, 1], [], []>} : vector<128x36xf32>, vector<36x128xf32>, vector<128x128xf32> -> vector<128x128xf32>
    %cst_13 = arith.constant dense<0.000000e+00> : vector<128xf32>
    %20 = vector.multi_reduction <add>, %19, %cst_13 [0] : vector<128x128xf32> to vector<128xf32>
    %21 = vector.shape_cast %20 : vector<128xf32> to vector<1x128xf32>
    %cst_14 = arith.constant 7.812500e-03 : f32
    %22 = vector.broadcast %cst_14 : f32 to vector<1x128xf32>
    %23 = arith.mulf %21, %22 : vector<1x128xf32>
    %24 = vector.broadcast %23 : vector<1x128xf32> to vector<128x128xf32>
    %25 = arith.subf %19, %24 : vector<128x128xf32>
    %26 = arith.mulf %25, %25 : vector<128x128xf32>
    %cst_15 = arith.constant dense<0.000000e+00> : vector<128xf32>
    %27 = vector.multi_reduction <add>, %26, %cst_15 [0] : vector<128x128xf32> to vector<128xf32>
    %28 = vector.shape_cast %27 : vector<128xf32> to vector<1x128xf32>
    %29 = tpu.concatenate %21, %28 in 0 : vector<1x128xf32>, vector<1x128xf32> -> vector<2x128xf32>
    %30 = vector.shape_cast %29 : vector<2x128xf32> to vector<1x1x2x128xf32>
    %c0_16 = arith.constant 0 : index
    %c0_17 = arith.constant 0 : index
    %c0_18 = arith.constant 0 : index
    %c0_19 = arith.constant 0 : index
    %31 = vector.load %arg7[%c0_16, %c0_17, %c0_18, %c0_19] : memref<1x1x2x128xf32, #tpu.memory_space<vmem>>, vector<1x1x2x128xf32>
    tpu.vector_store %arg7[%c0_16, %c0_17, %c0_18, %c0_19], %30 {strides = array<i32>} : memref<1x1x2x128xf32, #tpu.memory_space<vmem>>, vector<1x1x2x128xf32>,
    %32 = vector.shape_cast %19 : vector<128x128xf32> to vector<1x128x128xf32>
    %c0_20 = arith.constant 0 : index
    %c0_21 = arith.constant 0 : index
    %c0_22 = arith.constant 0 : index
    %33 = vector.load %arg6[%c0_20, %c0_21, %c0_22] : memref<1x128x128xf32, #tpu.memory_space<vmem>>, vector<1x128x128xf32>
    tpu.vector_store %arg6[%c0_20, %c0_21, %c0_22], %32 {strides = array<i32>} : memref<1x128x128xf32, #tpu.memory_space<vmem>>, vector<1x128x128xf32>,
    return
  }
  func.func @transform_0(%arg0: i32, %arg1: i32) -> (i32, i32, i32, i32) {
    %c0_i32 = arith.constant 0 : i32
    %c0_i32_0 = arith.constant 0 : i32
    %c0_i32_1 = arith.constant 0 : i32
    return %arg0, %arg1, %c0_i32, %c0_i32_0 : i32, i32, i32, i32
  }
  func.func @transform_1(%arg0: i32, %arg1: i32) -> (i32, i32, i32, i32) {
    %c1_i32 = arith.constant 1 : i32
    %0 = arith.addi %arg1, %c1_i32 : i32
    %c8_i32 = arith.constant 8 : i32
    %1 = arith.muli %0, %c8_i32 : i32
    %c0_i32 = arith.constant 0 : i32
    %c0_i32_0 = arith.constant 0 : i32
    %c0_i32_1 = arith.constant 0 : i32
    return %arg0, %1, %c0_i32, %c0_i32_0 : i32, i32, i32, i32
  }
  func.func @transform_2(%arg0: i32, %arg1: i32) -> (i32, i32, i32, i32) {
    %c1_i32 = arith.constant 1 : i32
    %0 = arith.addi %arg1, %c1_i32 : i32
    %c8_i32 = arith.constant 8 : i32
    %1 = arith.muli %0, %c8_i32 : i32
    %c1_i32_0 = arith.constant 1 : i32
    %2 = arith.addi %1, %c1_i32_0 : i32
    %c0_i32 = arith.constant 0 : i32
    %c0_i32_1 = arith.constant 0 : i32
    %c0_i32_2 = arith.constant 0 : i32
    return %arg0, %2, %c0_i32, %c0_i32_1 : i32, i32, i32, i32
  }
  func.func @transform_3(%arg0: i32, %arg1: i32) -> (i32, i32) {
    %c0_i32 = arith.constant 0 : i32
    %c0_i32_0 = arith.constant 0 : i32
    %c0_i32_1 = arith.constant 0 : i32
    return %c0_i32, %c0_i32_0 : i32, i32
  }
  func.func @transform_4(%arg0: i32, %arg1: i32) -> (i32, i32, i32) {
    %c0_i32 = arith.constant 0 : i32
    %c0_i32_0 = arith.constant 0 : i32
    return %arg0, %arg1, %c0_i32 : i32, i32, i32
  }
  func.func @transform_5(%arg0: i32, %arg1: i32) -> (i32, i32, i32, i32) {
    %c0_i32 = arith.constant 0 : i32
    %c0_i32_0 = arith.constant 0 : i32
    %c0_i32_1 = arith.constant 0 : i32
    return %arg0, %arg1, %c0_i32, %c0_i32_0 : i32, i32, i32, i32
  }
}

</mosaic_0001>

<bundles_post_ra>
// kernel: tpu_custom_call.1
= control target key start
LH: loop header
LB: loop body
LE: loop exit
PB: predicated region body
PF: predicated region fallthrough
CT: control target
= control target key end

     0   :  { %s2799_s0 = inlined_call_operand.vmem [shape: f32[2,18,18,4], index: 0, kind: input, shape index: {}]   ;;  %s2800_s1 = inlined_call_operand.vmem [shape: f32[2,18,18,4], index: 1, kind: input, shape index: {}]   ;;  %s2801_s2 = inlined_call_operand.vmem [shape: f32[2,18,18,4], index: 2, kind: input, shape index: {}]   ;;  %s2802_s3 = inlined_call_operand.vmem [shape: f32[36,128], index: 3, kind: input, shape index: {}]   ;;  %s2803_s4 = inlined_call_operand.hbm [shape: f32[2,256,128], index: 4, kind: output, shape index: {0}]   ;;  %s2804_s5 = inlined_call_operand.hbm [shape: f32[2,2,2,128], index: 5, kind: output, shape index: {1}]  }
   0x1   :  { %2819 = sst [smem:[#allocation8_spill]] %s2799_s0 }
   0x2   :  { %11 = vsyncpa [#allocation3], 0 }
   0x3   :  { %13 = vsyncpa [#allocation3 + $0x1], 0 }
   0x4   :  { %14 = vsyncpa [#allocation5], 0 }
   0x5   :  { %16 = vsyncpa [#allocation5 + $0x1], 0  ;;  %s1956_s18 = smov 0   ;;  %s1958_s19 = smov 0  }
   0x6   :  { %s1960_s20 = smov 0   ;;  %s1962_s21 = smov 0  }
   0x7   :  { %s1964_s22 = smov 0   ;;  %s1966_s23 = smov 0  }
   0x8   :  { %s1968_s24 = smov 0   ;;  %s1970_s25 = smov 0  }
   0x9 LB: > { %s1574_s26 = sadd.s32 4294967295, %s1913_s25   ;;  %s1575_s27 = sadd.s32 4294967294, %s1913_s25   ;;  %s1913_s25 = sphi %s1970_s25, %s22_s25   ;;  %s1909_s24 = sphi %s1968_s24, %s2836_s24   ;;  %s1905_s23 = sphi %s1966_s23, %s2835_s23   ;;  %s1901_s22 = sphi %s1964_s22, %s2834_s22   ;;  %s1897_s21 = sphi %s1962_s21, %s2833_s21   ;;  %s1893_s20 = sphi %s1960_s20, %s2832_s20   ;;  %s1889_s19 = sphi %s1958_s19, %s2831_s19   ;;  %s1885_s18 = sphi %s1956_s18, %s2830_s18  }
   0xa   : > { %s31_s28 = sadd.s32 1, %s1905_s23  ;;  %s34_s29 = sadd.s32 1, %s1909_s24 }
   0xb   : > { %p32_p0 = scmp.ge.s32.totalorder %s31_s28, 2  ;;  %p168_p1 = scmp.ne.s32.totalorder %s1893_s20, %s1889_s19 }
   0xc   : > { %p169_p2 = scmp.eq.s32.totalorder %s1574_s26, 3  ;;  %p174_p5 = scmp.ne.s32.totalorder %s1889_s19, %s1885_s18 }
   0xd   : > { %s2838_s28 = smov (%p32_p0, %s31_s28), 0  ;;  %s2840_s29 = smov (!%p32_p0, %s34_s29), %s1909_s24 }
   0xe   : > { %s154_s30 = ssub.s32 %s1905_s23, %s2838_s28  ;;  %p2007_p3 = por %p169_p2, %p168_p1 }
   0xf   : > { %p36_p4 = scmp.ge.s32.totalorder %s2840_s29, 2  ;;  %p175_p6 = scmp.eq.s32.totalorder %s1575_s27, 3 }
  0x10   : > { %p1582_p7 = scmp.ge.s32.totalorder %s1913_s25, 1  ;;  %p282_p9 = scmp.lt.s32.totalorder %s1913_s25, 5 }
  0x11   : > { %s2842_s29 = smov (%p36_p4, %s2840_s29), 0  ;;  %p2016_p8 = por %p175_p6, %p174_p5 }
  0x12   : > { %s153_s8 = ssub.s32 %s1909_s24, %s2842_s29  ;;  %s158_s9 = sadd.s32 1, %s1893_s20 }
  0x13   : > { %s155_s10 = sor.u32 %s154_s30, %s153_s8  ;;  %p283_p10 = pnand %p1582_p7, %p282_p9 }
  0x14   : > { %p156_p11 = scmp.eq.s32.totalorder %s155_s10, 0  ;;  %s2028_s12 = sshll.u32 (!%p283_p10), %s1897_s21, 3  ;;  %vm541_vm0 = vcmask (!%p283_p10), 1045504   ;;  %vm452_vm1 = vcmask (!%p283_p10), 1046528   ;;  %v1080_v28 = vld [vmem:[%s2802_s3] sm:$0xff] (!%p283_p10)  ;;  %v1081_v29 = vld [vmem:[%s2802_s3 + $0x8] sm:$0xff] (!%p283_p10) }
  0x15   : > { %286 = sbr.rel (%p283_p10) target bundleno = 711 (0x2c7), region = 36  ;;  %p354_p12 = scmp.lt.s32.totalorder (!%p283_p10), %s1901_s22, 1  ;;  %v1684_v30 = vpack.c.bf16 (!%p283_p10), %v1081_v29, %v1080_v28  ;;  %v1082_v33 = vld [vmem:[%s2802_s3 + $0x10] sm:$0xff] (!%p283_p10)  ;;  %v1083_v34 = vld [vmem:[%s2802_s3 + $0x18] sm:$0xff] (!%p283_p10)  ;;  %v1084_v38 = vld [vmem:[%s2802_s3 + $0x20] sm:$0xf] (!%p283_p10) }
  0x16   : > { %s2025_s11 = scalar_select %p156_p11, %s1893_s20, %s158_s9  }
  0x17   : > { %p356_p13 = scmp.lt.s32.totalorder (!%p283_p10), %s2028_s12, 17  ;;  %s2822_s0 = sld [smem:[#allocation8_spill]] (!%p283_p10)  ;;  %1685 = vmatprep.subr.bf16.mxu0 (!%p283_p10), %v1684_v30  ;;  %1692 = vmatprep.subr.bf16.mxu1 (!%p283_p10), %v1684_v30  ;;  %v1688_v36 = vpack.c.bf16 (!%p283_p10), %v1083_v34, %v1082_v33  ;;  %vm1134_vm2 = vcmask (!%p283_p10), 1043456   ;;  %vm944_vm3 = vcmask (!%p283_p10), 31744   ;;  %vm961_vm4 = vcmask (!%p283_p10), 64512  }
  0x18   : > { %s2813_s9 = smov (!%p283_p10), 12   ;;  %s2809_s10 = smov (!%p283_p10), 8   ;;  %1687 = vmatpush3.bf16.msra.mxu0 (!%p283_p10), %v1684_v30  ;;  %1695 = vmatpush3.bf16.msra.mxu1 (!%p283_p10), %v1684_v30  ;;  %vm978_vm5 = vcmask (!%p283_p10), 97280   ;;  %vm995_vm6 = vcmask (!%p283_p10), 130048   ;;  %vm1012_vm7 = vcmask (!%p283_p10), 162816   ;;  %vm1029_vm8 = vcmask (!%p283_p10), 195584  }
  0x19   : > { %1689 = vmatprep.subr.bf16.mxu0 (!%p283_p10), %v1688_v36  ;;  %1693 = vmatprep.subr.bf16.mxu1 (!%p283_p10), %v1688_v36  ;;  %s2826_s27 = smov (!%p283_p10), 8   ;;  %vm1046_vm9 = vcmask (!%p283_p10), 228352   ;;  %vm1063_vm10 = vcmask (!%p283_p10), 261120   ;;  %vm1085_vm11 = vcmask (!%p283_p10), 293888   ;;  %s2367_s30 = sadd.s32 (!%p283_p10), 8, %s2028_s12 }
  0x1a   : > { %p373_p0 = scmp.lt.s32.totalorder (!%p283_p10), %s2367_s30, 17 }
  0x1c   : > { %s355_s13 = scalar_select %p354_p12, %s1901_s22, 1  ;;  %1691 = vmatpush3.bf16.msra.mxu0 %v1688_v36  ;;  %1696 = vmatpush3.bf16.msra.mxu1 %v1688_v36 }
  0x1d   : > { %s357_s14 = scalar_select %p356_p13, %s2028_s12, 17  ;;  %1658 = vmatprep.subr.msk.mxu0 %vm1134_vm2, %v1084_v38  ;;  %1694 = vmatprep.subr.msk.mxu1 %vm1134_vm2, %v1084_v38 }
  0x1e   : > { %s2034_s15 = smul.u32 54, %s355_s13  ;;  %s2811_s13 = smov 4  }
  0x1f   : > { %s1698_s16 = smul.u32 3, %s357_s14  ;;  %s2805_s14 = smov 16  }
  0x20   : > { %1659 = vmatpush3.msk.msra.mxu0 %vm1134_vm2, %v1084_v38  ;;  %1697 = vmatpush3.msk.msra.mxu1 %vm1134_vm2, %v1084_v38  ;;  %s374_s12 = scalar_select %p373_p0, %s2367_s30, 17 }
  0x21   : > { %s360_s17 = sadd.s32 %s2034_s15, %s1698_s16  ;;  %s2807_s16 = smov 20  }
  0x22   : > { %s1586_s26 = sshll.u32 %s360_s17, 3  ;;  %s2823_s17 = smov 16  }
  0x23   : > { %s2040_s8 = scalar_lea.vmem %s2822_s0, %s1586_s26  ;;  %s2825_s26 = smov 20  }
  0x24   : > { %v2043_v0 = vld [vmem:[%s2040_s8 + $0x20] sm:$0xff]  ;;  %v2046_v1 = vld [vmem:[%s2040_s8 + $0x18] sm:$0xff]  ;;  %v2056_v3 = vld [vmem:[%s2040_s8 + $0x8] sm:$0xff] }
  0x25   : > { %v2049_v2 = vld [vmem:[%s2040_s8] sm:$0xff]  ;;  %634 = vrot.lane.b32.xlu1 %v2043_v0, %s2813_s9  ;;  %632 = vrot.lane.b32.xlu0 %v2046_v1, %s2813_s9  ;;  %v400_v6 = vld [vmem:[%s2040_s8 + $0x10] sm:$0x3]  ;;  %v543_v7 = vrot.slane %v2056_v3, 2  ;;  %v454_v8 = vrot.slane %v2056_v3, 1  ;;  %v458_v15 = vrot.slane %v2046_v1, 1 }
  0x26   : > { %v542_v4 = vrot.slane %v2049_v2, 2  ;;  %v453_v5 = vrot.slane %v2049_v2, 1  ;;  %v545_v9 = vrot.slane %v400_v6, 2  ;;  %v456_v10 = vrot.slane %v400_v6, 1  ;;  %v403_v17 = vld [vmem:[%s2040_s8 + $0x28] sm:$0x3] }
  0x27   : > { %v459_v16 = vrot.slane %v2043_v0, 1  ;;  %v547_v19 = vrot.slane %v2046_v1, 2  ;;  %v548_v20 = vrot.slane %v2043_v0, 2  ;;  %v461_v21 = vrot.slane %v403_v17, 1  ;;  %v2086_v25 = vld [vmem:[%s2040_s8 + $0x30] sm:$0xff]  ;;  %v2090_v27 = vld [vmem:[%s2040_s8 + $0x38] sm:$0xff] }
  0x28   : > { %v544_v11 = vsel %vm541_vm0, %v542_v4, %v543_v7  ;;  %v455_v12 = vsel %vm452_vm1, %v453_v5, %v454_v8  ;;  %v546_v13 = vsel %vm541_vm0, %v543_v7, %v545_v9  ;;  %v457_v14 = vsel %vm452_vm1, %v454_v8, %v456_v10  ;;  %v406_v37 = vld [vmem:[%s2040_s8 + $0x40] sm:$0x3]  ;;  %v2137_v46 = vld [vmem:[%s2040_s8 + $0x48] sm:$0xff]  ;;  %v2140_v47 = vld [vmem:[%s2040_s8 + $0x50] sm:$0xff] }
  0x29   : > { %582 = vrot.lane.b32.xlu1 %v544_v11, %s2809_s10  ;;  %493 = vrot.lane.b32.xlu0 %v455_v12, %s2811_s13  ;;  %v460_v18 = vsel %vm452_vm1, %v458_v15, %v459_v16  ;;  %v549_v22 = vsel %vm541_vm0, %v547_v19, %v548_v20  ;;  %v462_v23 = vsel %vm452_vm1, %v459_v16, %v461_v21  ;;  %v550_v24 = vrot.slane %v403_v17, 2  ;;  %v409_v51 = vld [vmem:[%s2040_s8 + $0x58] sm:$0x3]  ;;  %v2172_v59 = vld [vmem:[%s2040_s8 + $0x60] sm:$0xff] }
  0x2a   : > { %v463_v31 = vrot.slane %v2086_v25, 1  ;;  %v464_v32 = vrot.slane %v2090_v27, 1  ;;  %v552_v39 = vrot.slane %v2086_v25, 2  ;;  %v553_v40 = vrot.slane %v2090_v27, 2  ;;  %v2175_v60 = vld [vmem:[%s2040_s8 + $0x68] sm:$0xff]  ;;  %v2212_v17 = vld [vmem:[%s2040_s8 + $0x80] sm:$0xff] }
  0x2b   : > { %v551_v26 = vsel %vm541_vm0, %v548_v20, %v550_v24  ;;  %v466_v41 = vrot.slane %v406_v37, 1  ;;  %v555_v44 = vrot.slane %v406_v37, 2  ;;  %v468_v48 = vrot.slane %v2137_v46, 1  ;;  %v412_v4 = vld [vmem:[%s2040_s8 + $0x70] sm:$0x3] }
  0x2c   : > { %v465_v35 = vsel %vm452_vm1, %v463_v31, %v464_v32  ;;  %v554_v42 = vsel %vm541_vm0, %v552_v39, %v553_v40  ;;  %v469_v49 = vrot.slane %v2140_v47, 1  ;;  %v557_v52 = vrot.slane %v2137_v46, 2 }
  0x2d   : > { %584 = vrot.lane.b32.xlu1 %v546_v13, %s2809_s10  ;;  %495 = vrot.lane.b32.xlu0 %v457_v14, %s2811_s13  ;;  %v467_v43 = vsel %vm452_vm1, %v464_v32, %v466_v41  ;;  %v556_v45 = vsel %vm541_vm0, %v553_v40, %v555_v44  ;;  %v558_v53 = vrot.slane %v2140_v47, 2  ;;  %v471_v54 = vrot.slane %v409_v51, 1  ;;  %v2209_v14 = vld [vmem:[%s2040_s8 + $0x78] sm:$0xff] }
  0x2e   : > { %v470_v50 = vsel %vm452_vm1, %v468_v48, %v469_v49  ;;  %v560_v57 = vrot.slane %v409_v51, 2  ;;  %v473_v61 = vrot.slane %v2172_v59, 1  ;;  %v474_v62 = vrot.slane %v2175_v60, 1 }
  0x2f   : > { %v559_v55 = vsel %vm541_vm0, %v557_v52, %v558_v53  ;;  %v472_v56 = vsel %vm452_vm1, %v469_v49, %v471_v54  ;;  %v562_v5 = vrot.slane %v2172_v59, 2  ;;  %v563_v6 = vrot.slane %v2175_v60, 2  ;;  %v2259_v49 = vld [vmem:[%s2040_s8 + $0x90] sm:$0xff]  ;;  %v2267_v52 = vld [vmem:[%s2040_s8 + $0x98] sm:$0xff] }
  0x30   : > { %v561_v58 = vsel %vm541_vm0, %v558_v53, %v560_v57  ;;  %v475_v63 = vsel %vm452_vm1, %v473_v61, %v474_v62  ;;  %v476_v7 = vrot.slane %v412_v4, 1  ;;  %v565_v10 = vrot.slane %v412_v4, 2 }
  0x31   : > { %497 = vrot.lane.b32.xlu1 %v460_v18, %s2811_s13  ;;  %686 = vrot.lane.b32.xlu0 %v460_v18, %s2805_s14  ;;  %v564_v8 = vsel %vm541_vm0, %v562_v5, %v563_v6  ;;  %v478_v18 = vrot.slane %v2209_v14, 1  ;;  %v479_v19 = vrot.slane %v2212_v17, 1  ;;  %v567_v28 = vrot.slane %v2209_v14, 2 }
  0x32   : > { %v477_v9 = vsel %vm452_vm1, %v474_v62, %v476_v7  ;;  %v566_v11 = vsel %vm541_vm0, %v563_v6, %v565_v10  ;;  %v568_v29 = vrot.slane %v2212_v17, 2  ;;  %v483_v57 = vrot.slane %v2259_v49, 1 }
  0x34   : > { %v569_v33 = vsel %vm541_vm0, %v567_v28, %v568_v29 }
  0x35   : > { %739 = vrot.lane.b32.xlu1 %v549_v22, %s2807_s16  ;;  %688 = vrot.lane.b32.xlu0 %v462_v23, %s2805_s14  ;;  %s2815_s14 = smov 24  }
  0x39   : > { %586 = vrot.lane.b32.xlu1 %v549_v22, %s2809_s10  ;;  %499 = vrot.lane.b32.xlu0 %v462_v23, %s2811_s13  ;;  %s2824_s13 = smov 4   ;;  %v480_v22 = vsel %vm452_vm1, %v478_v18, %v479_v19 }
  0x3d   : > { %789 = vrot.lane.b32.xlu1 %v2086_v25, %s2815_s14  ;;  %741 = vrot.lane.b32.xlu0 %v551_v26, %s2807_s16  ;;  %s2817_s16 = smov 28  }
  0x41   : > { %636 = vrot.lane.b32.xlu1 %v2086_v25, %s2813_s9  ;;  %588 = vrot.lane.b32.xlu0 %v551_v26, %s2809_s10  ;;  %s1922_s10 = smov 32   ;;  %v415_v26 = vld [vmem:[%s2040_s8 + $0x88] sm:$0x3] }
  0x42   : > { %v481_v30 = vrot.slane %v415_v26, 1  ;;  %v570_v37 = vrot.slane %v415_v26, 2 }
  0x44   : > { %v482_v34 = vsel %vm452_vm1, %v479_v19, %v481_v30  ;;  %v571_v40 = vsel %vm541_vm0, %v568_v29, %v570_v37 }
  0x45   : > { %843 = vrot.lane.b32.xlu1 %v465_v35, %s2817_s16  ;;  %791 = vrot.lane.b32.xlu0 %v2090_v27, %s2815_s14 }
  0x49   : > { %690 = vrot.lane.b32.xlu1 %v465_v35, %s2823_s17  ;;  %638 = vrot.lane.b32.xlu0 %v2090_v27, %s2813_s9 }
  0x4d   : > { %896 = vrot.lane.b32.xlu1 %v554_v42, %s1922_s10  ;;  %845 = vrot.lane.b32.xlu0 %v467_v43, %s2817_s16 }
  0x51   : > { %692 = vrot.lane.b32.xlu1 %v467_v43, %s2823_s17  ;;  %501 = vrot.lane.b32.xlu0 %v465_v35, %s2824_s13 }
  0x55   : > { %898 = vrot.lane.b32.xlu1 %v556_v45, %s1922_s10  ;;  %743 = vrot.lane.b32.xlu0 %v554_v42, %s2825_s26 }
  0x59   : > { %590 = vrot.lane.b32.xlu1 %v554_v42, %s2826_s27  ;;  %503 = vrot.lane.b32.xlu0 %v467_v43, %s2824_s13 }
  0x5d   : > { %793 = vrot.lane.b32.xlu1 %v2137_v46, %s2815_s14  ;;  %745 = vrot.lane.b32.xlu0 %v556_v45, %s2825_s26 }
  0x61   : > { %640 = vrot.lane.b32.xlu1 %v2137_v46, %s2813_s9  ;;  %592 = vrot.lane.b32.xlu0 %v556_v45, %s2826_s27 }
  0x65   : > { %847 = vrot.lane.b32.xlu1 %v470_v50, %s2817_s16  ;;  %795 = vrot.lane.b32.xlu0 %v2140_v47, %s2815_s14 }
  0x69   : > { %694 = vrot.lane.b32.xlu1 %v470_v50, %s2823_s17  ;;  %642 = vrot.lane.b32.xlu0 %v2140_v47, %s2813_s9 }
  0x6d   : > { %900 = vrot.lane.b32.xlu1 %v559_v55, %s1922_s10  ;;  %849 = vrot.lane.b32.xlu0 %v472_v56, %s2817_s16 }
  0x71   : > { %696 = vrot.lane.b32.xlu1 %v472_v56, %s2823_s17  ;;  %505 = vrot.lane.b32.xlu0 %v470_v50, %s2824_s13 }
  0x75   : > { %902 = vrot.lane.b32.xlu1 %v561_v58, %s1922_s10  ;;  %747 = vrot.lane.b32.xlu0 %v559_v55, %s2825_s26 }
  0x79   : > { %594 = vrot.lane.b32.xlu1 %v559_v55, %s2826_s27  ;;  %507 = vrot.lane.b32.xlu0 %v472_v56, %s2824_s13 }
  0x7d   : > { %797 = vrot.lane.b32.xlu1 %v2172_v59, %s2815_s14  ;;  %749 = vrot.lane.b32.xlu0 %v561_v58, %s2825_s26 }
  0x81   : > { %644 = vrot.lane.b32.xlu1 %v2172_v59, %s2813_s9  ;;  %596 = vrot.lane.b32.xlu0 %v561_v58, %s2826_s27  ;;  %v484_v58 = vrot.slane %v2267_v52, 1 }
  0x83   : > { %v485_v5 = vsel %vm452_vm1, %v483_v57, %v484_v58 }
  0x85   : > { %851 = vrot.lane.b32.xlu1 %v475_v63, %s2817_s16  ;;  %799 = vrot.lane.b32.xlu0 %v2175_v60, %s2815_s14 }
  0x89   : > { %698 = vrot.lane.b32.xlu1 %v475_v63, %s2823_s17  ;;  %646 = vrot.lane.b32.xlu0 %v2175_v60, %s2813_s9 }
  0x8d   : > { %904 = vrot.lane.b32.xlu1 %v564_v8, %s1922_s10  ;;  %853 = vrot.lane.b32.xlu0 %v477_v9, %s2817_s16 }
  0x91   : > { %700 = vrot.lane.b32.xlu1 %v477_v9, %s2823_s17  ;;  %509 = vrot.lane.b32.xlu0 %v475_v63, %s2824_s13 }
  0x95   : > { %906 = vrot.lane.b32.xlu1 %v566_v11, %s1922_s10  ;;  %751 = vrot.lane.b32.xlu0 %v564_v8, %s2825_s26 }
  0x97   : > { %v2204_v12 = vpop.permute.xlu1 %634  ;;  %v633_v13 = vpop.permute.xlu0 %632 }
  0x99   : > { %598 = vrot.lane.b32.xlu1 %v564_v8, %s2826_s27  ;;  %511 = vrot.lane.b32.xlu0 %v477_v9, %s2824_s13  ;;  %v418_v9 = vld [vmem:[%s2040_s8 + $0xa0] sm:$0x3] }
  0x9a   : > { %v575_v29 = vrot.slane %v418_v9, 2 }
  0x9b   : > { %v583_v15 = vpop.permute.xlu1 %582  ;;  %v494_v16 = vpop.permute.xlu0 %493 }
  0x9c   : > { %v945_v43 = vsel %vm944_vm3, %v2049_v2, %v494_v16  ;;  %v486_v16 = vrot.slane %v418_v9, 1 }
  0x9d   : > { %801 = vrot.lane.b32.xlu1 %v2209_v14, %s2815_s14  ;;  %753 = vrot.lane.b32.xlu0 %v566_v11, %s2825_s26  ;;  %v962_v48 = vsel %vm961_vm4, %v945_v43, %v583_v15  ;;  %v572_v15 = vrot.slane %v2259_v49, 2  ;;  %v2334_v43 = vld [vmem:[%s2040_s8 + $0xa8] sm:$0xff] }
  0x9e   : > { %v979_v2 = vsel %vm978_vm5, %v962_v48, %v633_v13 }
  0x9f   : > { %v2219_v20 = vpop.permute.xlu1 %584  ;;  %v496_v21 = vpop.permute.xlu0 %495 }
  0xa0   : > { %v946_v54 = vsel %vm944_vm3, %v2056_v3, %v496_v21 }
  0xa1   : > { %648 = vrot.lane.b32.xlu1 %v2209_v14, %s2813_s9  ;;  %600 = vrot.lane.b32.xlu0 %v566_v11, %s2826_s27  ;;  %v963_v3 = vsel %vm961_vm4, %v946_v54, %v2219_v20 }
  0xa2   : > { %v980_v6 = vsel %vm978_vm5, %v963_v3, %v2204_v12  ;;  %v573_v12 = vrot.slane %v2267_v52, 2 }
  0xa3   : > { %v2225_v23 = vpop.permute.xlu1 %497  ;;  %v687_v24 = vpop.permute.xlu0 %686 }
  0xa4   : > { %v996_v53 = vsel %vm995_vm6, %v979_v2, %v687_v24  ;;  %v487_v24 = vsel %vm452_vm1, %v484_v58, %v486_v16  ;;  %v2343_v2 = vld [vmem:[%s2040_s8 + $0xb0] sm:$0xff] }
  0xa5   : > { %855 = vrot.lane.b32.xlu1 %v480_v22, %s2817_s16  ;;  %803 = vrot.lane.b32.xlu0 %v2212_v17, %s2815_s14 }
  0xa7   : > { %v740_v31 = vpop.permute.xlu1 %739  ;;  %v689_v32 = vpop.permute.xlu0 %688 }
  0xa8   : > { %v1013_v55 = vsel %vm1012_vm7, %v996_v53, %v740_v31  ;;  %v997_v10 = vsel %vm995_vm6, %v980_v6, %v689_v32  ;;  %v576_v32 = vsel %vm541_vm0, %v573_v12, %v575_v29  ;;  %v489_v53 = vrot.slane %v2343_v2, 1 }
  0xa9   : > { %702 = vrot.lane.b32.xlu1 %v480_v22, %s2823_s17  ;;  %650 = vrot.lane.b32.xlu0 %v2212_v17, %s2813_s9 }
  0xab   : > { %v2238_v35 = vpop.permute.xlu1 %586  ;;  %v2240_v36 = vpop.permute.xlu0 %499 }
  0xac   : > { %v948_v57 = vsel %vm944_vm3, %v2043_v0, %v2240_v36  ;;  %v421_v36 = vld [vmem:[%s2040_s8 + $0xb8] sm:$0x3]  ;;  %s1700_s8 = smul.u32 3, %s374_s12 }
  0xad   : > { %908 = vrot.lane.b32.xlu1 %v569_v33, %s1922_s10  ;;  %857 = vrot.lane.b32.xlu0 %v482_v34, %s2817_s16  ;;  %v491_v6 = vrot.slane %v421_v36, 1 }
  0xaf   : > { %v790_v38 = vpop.permute.xlu1 %789  ;;  %v742_v39 = vpop.permute.xlu0 %741 }
  0xb0   : > { %v1030_v56 = vsel %vm1029_vm8, %v1013_v55, %v790_v38  ;;  %v1014_v11 = vsel %vm1012_vm7, %v997_v10, %v742_v39  ;;  %v947_v39 = vsel %vm944_vm3, %v2046_v1, %v2225_v23 }
  0xb1   : > { %704 = vrot.lane.b32.xlu1 %v482_v34, %s2823_s17  ;;  %513 = vrot.lane.b32.xlu0 %v480_v22, %s2824_s13  ;;  %v574_v22 = vsel %vm541_vm0, %v572_v15, %v573_v12  ;;  %v492_v15 = vsel %vm452_vm1, %v489_v53, %v491_v6 }
  0xb3   : > { %v2247_v41 = vpop.permute.xlu1 %636  ;;  %v2249_v42 = vpop.permute.xlu0 %588 }
  0xb4   : > { %v965_v58 = vsel %vm961_vm4, %v948_v57, %v2249_v42 }
  0xb5   : > { %910 = vrot.lane.b32.xlu1 %v571_v40, %s1922_s10  ;;  %755 = vrot.lane.b32.xlu0 %v569_v33, %s2825_s26 }
  0xb7   : > { %v844_v44 = vpop.permute.xlu1 %843  ;;  %v792_v45 = vpop.permute.xlu0 %791 }
  0xb8   : > { %v1047_v61 = vsel %vm1046_vm9, %v1030_v56, %v844_v44  ;;  %v1031_v13 = vsel %vm1029_vm8, %v1014_v11, %v792_v45 }
  0xb9   : > { %602 = vrot.lane.b32.xlu1 %v569_v33, %s2826_s27  ;;  %515 = vrot.lane.b32.xlu0 %v482_v34, %s2824_s13 }
  0xbb   : > { %v2262_v50 = vpop.permute.xlu1 %690  ;;  %v2264_v51 = vpop.permute.xlu0 %638 }
  0xbd   : > { %805 = vrot.lane.b32.xlu1 %v2259_v49, %s2815_s14  ;;  %757 = vrot.lane.b32.xlu0 %v571_v40, %s2825_s26 }
  0xbf   : > { %v897_v62 = vpop.permute.xlu1 %896  ;;  %v846_v63 = vpop.permute.xlu0 %845 }
  0xc0   : > { %v1064_v4 = vsel %vm1063_vm10, %v1047_v61, %v897_v62  ;;  %v1048_v18 = vsel %vm1046_vm9, %v1031_v13, %v846_v63  ;;  %v982_v62 = vsel %vm978_vm5, %v965_v58, %v2264_v51  ;;  %v577_v51 = vrot.slane %v2334_v43, 2 }
  0xc1   : > { %652 = vrot.lane.b32.xlu1 %v2259_v49, %s2813_s9  ;;  %604 = vrot.lane.b32.xlu0 %v571_v40, %s2826_s27  ;;  %v964_v40 = vsel %vm961_vm4, %v947_v39, %v2238_v35 }
  0xc2   : > { %1660 = vmatprep.mubr.msk.f32.mxu0 %vm1085_vm11, %v1064_v4  ;;  %v981_v44 = vsel %vm978_vm5, %v964_v40, %v2247_v41  ;;  %v488_v41 = vrot.slane %v2334_v43, 1 }
  0xc3   : > { %v2290_v7 = vpop.permute.xlu1 %692  ;;  %v2292_v8 = vpop.permute.xlu0 %501  ;;  %v998_v1 = vsel %vm995_vm6, %v981_v44, %v2262_v50 }
  0xc4   : > { %v490_v61 = vsel %vm452_vm1, %v488_v41, %v489_v53  ;;  %v999_v3 = vsel %vm995_vm6, %v982_v62, %v2290_v7 }
  0xc5   : > { %859 = vrot.lane.b32.xlu1 %v485_v5, %s2817_s16  ;;  %807 = vrot.lane.b32.xlu0 %v2267_v52, %s2815_s14 }
  0xc7   : > { %v899_v19 = vpop.permute.xlu1 %898  ;;  %v744_v20 = vpop.permute.xlu0 %743 }
  0xc8   : > { %v1065_v21 = vsel %vm1063_vm10, %v1048_v18, %v899_v19  ;;  %v1015_v23 = vsel %vm1012_vm7, %v998_v1, %v744_v20  ;;  %v580_v18 = vrot.slane %v421_v36, 2 }
  0xc9   : > { %706 = vrot.lane.b32.xlu1 %v485_v5, %s2823_s17  ;;  %654 = vrot.lane.b32.xlu0 %v2267_v52, %s2813_s9 }
  0xca   : > { %1661 = vmatmul.mubr.msk.f32.vlgmr.msra.gmra.mrb[0].mxu0 %vm1085_vm11, %v1065_v21 }
  0xcb   : > { %v2311_v26 = vpop.permute.xlu1 %590  ;;  %v2313_v28 = vpop.permute.xlu0 %503 }
  0xcd   : > { %912 = vrot.lane.b32.xlu1 %v574_v22, %s1922_s10  ;;  %861 = vrot.lane.b32.xlu0 %v487_v24, %s2817_s16 }
  0xcf   : > { %v794_v30 = vpop.permute.xlu1 %793  ;;  %v746_v31 = vpop.permute.xlu0 %745 }
  0xd0   : > { %v1032_v35 = vsel %vm1029_vm8, %v1015_v23, %v794_v30  ;;  %v1016_v42 = vsel %vm1012_vm7, %v999_v3, %v746_v31  ;;  %v949_v31 = vsel %vm944_vm3, %v2086_v25, %v2292_v8 }
  0xd1   : > { %708 = vrot.lane.b32.xlu1 %v487_v24, %s2823_s17  ;;  %517 = vrot.lane.b32.xlu0 %v485_v5, %s2824_s13  ;;  %v578_v5 = vrot.slane %v2343_v2, 2 }
  0xd3   : > { %v2320_v33 = vpop.permute.xlu1 %640  ;;  %v2322_v34 = vpop.permute.xlu0 %592  ;;  %v579_v13 = vsel %vm541_vm0, %v577_v51, %v578_v5  ;;  %v581_v21 = vsel %vm541_vm0, %v578_v5, %v580_v18 }
  0xd5   : > { %914 = vrot.lane.b32.xlu1 %v576_v32, %s1922_s10  ;;  %759 = vrot.lane.b32.xlu0 %v574_v22, %s2825_s26 }
  0xd7   : > { %v848_v37 = vpop.permute.xlu1 %847  ;;  %v796_v38 = vpop.permute.xlu0 %795 }
  0xd8   : > { %v1049_v54 = vsel %vm1046_vm9, %v1032_v35, %v848_v37  ;;  %v1033_v4 = vsel %vm1029_vm8, %v1016_v42, %v796_v38 }
  0xd9   : > { %606 = vrot.lane.b32.xlu1 %v574_v22, %s2826_s27  ;;  %519 = vrot.lane.b32.xlu0 %v487_v24, %s2824_s13 }
  0xdb   : > { %v2338_v45 = vpop.permute.xlu1 %694  ;;  %v2340_v48 = vpop.permute.xlu0 %642 }
  0xdd   : > { %809 = vrot.lane.b32.xlu1 %v2334_v43, %s2815_s14  ;;  %761 = vrot.lane.b32.xlu0 %v576_v32, %s2825_s26 }
  0xdf   : > { %v901_v55 = vpop.permute.xlu1 %900  ;;  %v850_v56 = vpop.permute.xlu0 %849 }
  0xe0   : > { %v1066_v50 = vsel %vm1063_vm10, %v1049_v54, %v901_v55  ;;  %v1050_v9 = vsel %vm1046_vm9, %v1033_v4, %v850_v56 }
  0xe1   : > { %656 = vrot.lane.b32.xlu1 %v2334_v43, %s2813_s9  ;;  %608 = vrot.lane.b32.xlu0 %v576_v32, %s2826_s27  ;;  %v966_v32 = vsel %vm961_vm4, %v949_v31, %v2311_v26 }
  0xe2   : > { %1663 = vmatprep.mubr.msk.f32.mxu0 %vm1085_vm11, %v1066_v50  ;;  %v983_v38 = vsel %vm978_vm5, %v966_v32, %v2320_v33 }
  0xe3   : > { %v2371_v63 = vpop.permute.xlu1 %696  ;;  %v2373_v0 = vpop.permute.xlu0 %505  ;;  %v1000_v25 = vsel %vm995_vm6, %v983_v38, %v2338_v45  ;;  %v950_v45 = vsel %vm944_vm3, %v2090_v27, %v2313_v28 }
  0xe4   : > { %v967_v54 = vsel %vm961_vm4, %v950_v45, %v2322_v34 }
  0xe5   : > { %863 = vrot.lane.b32.xlu1 %v490_v61, %s2817_s16  ;;  %811 = vrot.lane.b32.xlu0 %v2343_v2, %s2815_s14  ;;  %v984_v56 = vsel %vm978_vm5, %v967_v54, %v2340_v48 }
  0xe6   : > { %v1001_v27 = vsel %vm995_vm6, %v984_v56, %v2371_v63 }
  0xe7   : > { %v903_v10 = vpop.permute.xlu1 %902  ;;  %v748_v11 = vpop.permute.xlu0 %747 }
  0xe8   : > { %v1067_v7 = vsel %vm1063_vm10, %v1050_v9, %v903_v10  ;;  %v1017_v8 = vsel %vm1012_vm7, %v1000_v25, %v748_v11 }
  0xe9   : > { %710 = vrot.lane.b32.xlu1 %v490_v61, %s2823_s17  ;;  %658 = vrot.lane.b32.xlu0 %v2343_v2, %s2813_s9  ;;  %s377_s9 = sadd.s32 %s1700_s8, %s2034_s15 }
  0xea   : > { %1664 = vmatmul.mubr.msk.f32.gmra.mrb[2].mxu0 %vm1085_vm11, %v1067_v7  ;;  %s1588_s14 = sshll.u32 %s377_s9, 3  ;;  %s384_s9 = sadd.s32 1, %s2367_s30 }
  0xeb   : > { %v2395_v12 = vpop.permute.xlu1 %594  ;;  %v2397_v16 = vpop.permute.xlu0 %507  ;;  %s2414_s0 = scalar_lea.vmem %s2800_s1, %s1588_s14  ;;  %s2827_s14 = smov 24  }
  0xec   : > { %v422_v37 = vld [vmem:[%s2414_s0] sm:$0xff]  ;;  %v423_v44 = vld [vmem:[%s2414_s0 + $0x8] sm:$0xff]  ;;  %p387_p1 = scmp.lt.s32.totalorder %s384_s9, 17  ;;  %v424_v50 = vld [vmem:[%s2414_s0 + $0x10] sm:$0x3] }
  0xed   : > { %916 = vrot.lane.b32.xlu1 %v579_v13, %s1922_s10  ;;  %865 = vrot.lane.b32.xlu0 %v492_v15, %s2817_s16  ;;  %v681_v1 = vrot.slane %v422_v37, 1  ;;  %v682_v33 = vrot.slane %v423_v44, 1  ;;  %s2828_s16 = smov 12   ;;  %v735_v62 = vrot.slane %v423_v44, 2  ;;  %v684_v48 = vrot.slane %v424_v50, 1 }
  0xee   : > { %s2844_s9 = smov (!%p387_p1, %s384_s9), 17  ;;  %v737_v9 = vrot.slane %v424_v50, 2 }
  0xef   : > { %v798_v19 = vpop.permute.xlu1 %797  ;;  %v750_v20 = vpop.permute.xlu0 %749  ;;  %v683_v55 = vsel %vm452_vm1, %v681_v1, %v682_v33  ;;  %s1701_s0 = smul.u32 3, %s2844_s9  ;;  %v685_v51 = vsel %vm452_vm1, %v682_v33, %v684_v48 }
  0xf0   : > { %v1034_v26 = vsel %vm1029_vm8, %v1017_v8, %v798_v19  ;;  %v1018_v28 = vsel %vm1012_vm7, %v1001_v27, %v750_v20  ;;  %v738_v7 = vsel %vm541_vm0, %v735_v62, %v737_v9 }
  0xf1   : > { %712 = vrot.lane.b32.xlu1 %v492_v15, %s2823_s17  ;;  %521 = vrot.lane.b32.xlu0 %v490_v61, %s2824_s13  ;;  %v734_v61 = vrot.slane %v422_v37, 2  ;;  %s391_s30 = sadd.s32 %s1701_s0, %s2034_s15  ;;  %s2608_s15 = sand.u32 1, %s1889_s19  }
  0xf2   : > { %s1590_s8 = sshll.u32 %s391_s30, 3 }
  0xf3   : > { %v2405_v22 = vpop.permute.xlu1 %644  ;;  %v2407_v24 = vpop.permute.xlu0 %596  ;;  %v736_v63 = vsel %vm541_vm0, %v734_v61, %v735_v62 }
  0xf5   : > { %918 = vrot.lane.b32.xlu1 %v581_v21, %s1922_s10  ;;  %763 = vrot.lane.b32.xlu0 %v579_v13, %s2825_s26 }
  0xf7   : > { %v852_v29 = vpop.permute.xlu1 %851  ;;  %v800_v30 = vpop.permute.xlu0 %799 }
  0xf8   : > { %v1051_v23 = vsel %vm1046_vm9, %v1034_v26, %v852_v29  ;;  %v1035_v34 = vsel %vm1029_vm8, %v1018_v28, %v800_v30 }
  0xf9   : > { %610 = vrot.lane.b32.xlu1 %v579_v13, %s2826_s27  ;;  %523 = vrot.lane.b32.xlu0 %v492_v15, %s2824_s13  ;;  %s2829_s13 = smov 28  }
  0xfb   : > { %v2426_v39 = vpop.permute.xlu1 %698  ;;  %v2428_v40 = vpop.permute.xlu0 %646 }
  0xfd   : > { %813 = vrot.lane.b32.xlu1 %v422_v37, %s2827_s14  ;;  %765 = vrot.lane.b32.xlu0 %v581_v21, %s2825_s26 }
  0xff   : > { %v905_v35 = vpop.permute.xlu1 %904  ;;  %v854_v41 = vpop.permute.xlu0 %853 }
 0x100   : > { %v1068_v53 = vsel %vm1063_vm10, %v1051_v23, %v905_v35  ;;  %v1052_v36 = vsel %vm1046_vm9, %v1035_v34, %v854_v41 }
 0x101   : > { %660 = vrot.lane.b32.xlu1 %v422_v37, %s2828_s16  ;;  %612 = vrot.lane.b32.xlu0 %v581_v21, %s2826_s27  ;;  %v951_v37 = vsel %vm944_vm3, %v2137_v46, %v2373_v0 }
 0x102   : > { %1666 = vmatprep.mubr.msk.f32.mxu0 %vm1085_vm11, %v1068_v53  ;;  %v968_v25 = vsel %vm961_vm4, %v951_v37, %v2395_v12 }
 0x103   : > { %v2452_v57 = vpop.permute.xlu1 %700  ;;  %v2454_v58 = vpop.permute.xlu0 %509  ;;  %v985_v33 = vsel %vm978_vm5, %v968_v25, %v2405_v22 }
 0x104   : > { %v1002_v46 = vsel %vm995_vm6, %v985_v33, %v2426_v39  ;;  %v952_v39 = vsel %vm944_vm3, %v2140_v47, %v2397_v16  ;;  %v953_v9 = vsel %vm944_vm3, %v2172_v59, %v2454_v58 }
 0x105   : > { %867 = vrot.lane.b32.xlu1 %v683_v55, %s2829_s13  ;;  %815 = vrot.lane.b32.xlu0 %v423_v44, %s2827_s14  ;;  %v969_v56 = vsel %vm961_vm4, %v952_v39, %v2407_v24 }
 0x106   : > { %v986_v50 = vsel %vm978_vm5, %v969_v56, %v2428_v40 }
 0x107   : > { %v907_v3 = vpop.permute.xlu1 %906  ;;  %v752_v42 = vpop.permute.xlu0 %751  ;;  %v1003_v34 = vsel %vm995_vm6, %v986_v50, %v2452_v57 }
 0x108   : > { %v1069_v4 = vsel %vm1063_vm10, %v1052_v36, %v907_v3  ;;  %v1019_v0 = vsel %vm1012_vm7, %v1002_v46, %v752_v42 }
 0x109   : > { %714 = vrot.lane.b32.xlu1 %v683_v55, %s2823_s17  ;;  %662 = vrot.lane.b32.xlu0 %v423_v44, %s2828_s16  ;;  %s393_s16 = scalar_lea.vmem %s2801_s2, %s1590_s8 }
 0x10a   : > { %1667 = vmatmul.mubr.msk.f32.gmra.mrb[4].mxu0 %vm1085_vm11, %v1069_v4  ;;  %v426_v18 = vld [vmem:[%s393_s16 + $0x8] sm:$0xff]  ;;  %v427_v19 = vld [vmem:[%s393_s16 + $0x10] sm:$0x3]  ;;  %v425_v20 = vld [vmem:[%s393_s16] sm:$0xff]  ;;  %s1378_s16 = scalar_lea.sflag [#allocation3], %s2608_s15 }
 0x10b   : > { %v2470_v5 = vpop.permute.xlu1 %598  ;;  %v2472_v6 = vpop.permute.xlu0 %511  ;;  %v839_v21 = vrot.slane %v426_v18, 1  ;;  %v838_v29 = vrot.slane %v425_v20, 1  ;;  %v841_v30 = vrot.slane %v427_v19, 1  ;;  %v892_v38 = vrot.slane %v426_v18, 2 }
 0x10c   : > { %v891_v44 = vrot.slane %v425_v20, 2  ;;  %v894_v1 = vrot.slane %v427_v19, 2  ;;  %v954_v59 = vsel %vm944_vm3, %v2175_v60, %v2472_v6 }
 0x10d   : > { %920 = vrot.lane.b32.xlu1 %v736_v63, %s1922_s10  ;;  %869 = vrot.lane.b32.xlu0 %v685_v51, %s2829_s13  ;;  %v842_v8 = vsel %vm452_vm1, %v839_v21, %v841_v30  ;;  %v840_v26 = vsel %vm452_vm1, %v838_v29, %v839_v21 }
 0x10e   : > { %v895_v41 = vsel %vm541_vm0, %v892_v38, %v894_v1  ;;  %v893_v53 = vsel %vm541_vm0, %v891_v44, %v892_v38 }
 0x10f   : > { %v802_v10 = vpop.permute.xlu1 %801  ;;  %v754_v11 = vpop.permute.xlu0 %753 }
 0x110   : > { %v1036_v12 = vsel %vm1029_vm8, %v1019_v0, %v802_v10  ;;  %v1020_v61 = vsel %vm1012_vm7, %v1003_v34, %v754_v11  ;;  %v970_v10 = vsel %vm961_vm4, %v953_v9, %v2470_v5 }
 0x111   : > { %767 = vrot.lane.b32.xlu1 %v736_v63, %s2825_s26  ;;  %716 = vrot.lane.b32.xlu0 %v685_v51, %s2823_s17  ;;  %s1583_s17 = sshll.u32 %s2608_s15, 7 }
 0x113   : > { %v649_v13 = vpop.permute.xlu1 %648  ;;  %v2482_v15 = vpop.permute.xlu0 %600 }
 0x114   : > { %v987_v11 = vsel %vm978_vm5, %v970_v10, %v649_v13  ;;  %v971_v58 = vsel %vm961_vm4, %v954_v59, %v2482_v15 }
 0x115   : > { %769 = vrot.lane.b32.xlu1 %v738_v7, %s2825_s26  ;;  %922 = vrot.lane.b32.xlu0 %v738_v7, %s1922_s10  ;;  %s1610_s26 = sshll.u32 %s1897_s21, 4 }
 0x117   : > { %v856_v31 = vpop.permute.xlu1 %855  ;;  %v804_v32 = vpop.permute.xlu0 %803 }
 0x118   : > { %v1053_v45 = vsel %vm1046_vm9, %v1036_v12, %v856_v31  ;;  %v1037_v47 = vsel %vm1029_vm8, %v1020_v61, %v804_v32 }
 0x119   : > { %819 = vrot.lane.b32.xlu1 %v426_v18, %s2827_s14  ;;  %817 = vrot.lane.b32.xlu0 %v425_v20, %s2827_s14  ;;  %s1611_s14 = sshll.u32 %s1901_s22, 5 }
 0x11b   : > { %v703_v23 = vpop.permute.xlu1 %702  ;;  %v651_v35 = vpop.permute.xlu0 %650 }
 0x11c   : > { %v1004_v19 = vsel %vm995_vm6, %v987_v11, %v703_v23  ;;  %v988_v5 = vsel %vm978_vm5, %v971_v58, %v651_v35 }
 0x11d   : > { %873 = vrot.lane.b32.xlu1 %v842_v8, %s2829_s13  ;;  %871 = vrot.lane.b32.xlu0 %v840_v26, %s2829_s13  ;;  %s1395_s13 = sadd.s32 %s1611_s14, %s1610_s26  ;;  %s1923_s26 = smov [#allocation2]  }
 0x11e   : > { %s1612_s30 = sshll.u32 %s1395_s13, 7  ;;  %s1791_s14 = sshll.u32 %s1923_s26, 4  ;;  %s1792_s14 = int_to_ptr.vmem [resolvable:$false] %s1791_s14 }
 0x11f   : > { %v909_v22 = vpop.permute.xlu1 %908  ;;  %v858_v54 = vpop.permute.xlu0 %857  ;;  %s2692_s9 = scalar_lea.hbm %s2803_s4, %s1612_s30  ;;  %s1793_s13 = scalar_lea.vmem %s1792_s14, 4096 }
 0x120   : > { %v1070_v55 = vsel %vm1063_vm10, %v1053_v45, %v909_v22  ;;  %v1054_v16 = vsel %vm1046_vm9, %v1037_v47, %v858_v54 }
 0x121   : > { %926 = vrot.lane.b32.xlu1 %v895_v41, %s1922_s10  ;;  %924 = vrot.lane.b32.xlu0 %v893_v53, %s1922_s10  ;;  %s2614_s10 = scalar_lea.vmem [#allocation2], %s1583_s17 }
 0x122   : > { %1669 = vmatprep.mubr.msk.f32.mxu0 %vm1085_vm11, %v1070_v55  ;;  %s1398_s0 = sshll.u32 %s2614_s10, 4  ;;  %s2687_s0 = int_to_ptr.vmem [resolvable:$true] %s1398_s0 }
 0x123   : > { %v705_v27 = vpop.permute.xlu1 %704  ;;  %v514_v28 = vpop.permute.xlu0 %513  ;;  %s1787_s17 = scalar_lea.vmem %s2687_s0, 2048  ;;  %p1794_p6 = scmp.lt.s32.totalorder %s2687_s0, %s1792_s14 }
 0x124   : > { %v1005_v38 = vsel %vm995_vm6, %v988_v5, %v705_v27  ;;  %v955_v41 = vsel %vm944_vm3, %v2209_v14, %v514_v28  ;;  %p1788_p2 = scmp.ne.s32.totalorder %s2687_s0, %s1787_s17  ;;  %p1795_p7 = scmp.lt.s32.totalorder %s1793_s13, %s1787_s17 }
 0x126   : > { %p1789_p4 = pnand %p1788_p2, %p2007_p3  ;;  %p1796_p9 = por %p1795_p7, %p1794_p6 }
 0x127   : > { %v911_v62 = vpop.permute.xlu1 %910  ;;  %v756_v48 = vpop.permute.xlu0 %755 }
 0x128   : > { %v1071_v24 = vsel %vm1063_vm10, %v1054_v16, %v911_v62  ;;  %v1021_v20 = vsel %vm1012_vm7, %v1004_v19, %v756_v48  ;;  %p1790_p5 = pneg %p1789_p4 }
 0x129   : > { %1670 = vmatmul.mubr.msk.f32.gmra.mrb[6].mxu0 %vm1085_vm11, %v1071_v24 }
 0x12a   : > { %p1797_p10 = pnand %p1796_p9, %p1790_p5 }
 0x12b   : > { %v603_v36 = vpop.permute.xlu1 %602  ;;  %v516_v3 = vpop.permute.xlu0 %515 }
 0x12c   : > { %v972_v53 = vsel %vm961_vm4, %v955_v41, %v603_v36  ;;  %v956_v14 = vsel %vm944_vm3, %v2212_v17, %v516_v3 }
 0x12f   : > { %v806_v40 = vpop.permute.xlu1 %805  ;;  %v758_v42 = vpop.permute.xlu0 %757 }
 0x130   : > { %v1038_v21 = vsel %vm1029_vm8, %v1021_v20, %v806_v40  ;;  %v1022_v44 = vsel %vm1012_vm7, %v1005_v38, %v758_v42 }
 0x133   : > { %v653_v4 = vpop.permute.xlu1 %652  ;;  %v605_v63 = vpop.permute.xlu0 %604 }
 0x134   : > { %v989_v45 = vsel %vm978_vm5, %v972_v53, %v653_v4  ;;  %v973_v28 = vsel %vm961_vm4, %v956_v14, %v605_v63 }
 0x137   : > { %v860_v51 = vpop.permute.xlu1 %859  ;;  %v808_v57 = vpop.permute.xlu0 %807 }
 0x138   : > { %v1055_v29 = vsel %vm1046_vm9, %v1038_v21, %v860_v51  ;;  %v1039_v25 = vsel %vm1029_vm8, %v1022_v44, %v808_v57 }
 0x13b   : > { %v707_v7 = vpop.permute.xlu1 %706  ;;  %v655_v18 = vpop.permute.xlu0 %654 }
 0x13c   : > { %v1006_v55 = vsel %vm995_vm6, %v989_v45, %v707_v7  ;;  %v990_v47 = vsel %vm978_vm5, %v973_v28, %v655_v18 }
 0x13f   : > { %v913_v30 = vpop.permute.xlu1 %912  ;;  %v862_v31 = vpop.permute.xlu0 %861 }
 0x140   : > { %v1072_v32 = vsel %vm1063_vm10, %v1055_v29, %v913_v30  ;;  %v1056_v8 = vsel %vm1046_vm9, %v1039_v25, %v862_v31 }
 0x141   : > { %1672 = vmatprep.mubr.msk.f32.mxu1 %vm1085_vm11, %v1072_v32 }
 0x143   : > { %v709_v13 = vpop.permute.xlu1 %708  ;;  %v518_v37 = vpop.permute.xlu0 %517 }
 0x144   : > { %v1007_v48 = vsel %vm995_vm6, %v990_v47, %v709_v13  ;;  %v957_v18 = vsel %vm944_vm3, %v2259_v49, %v518_v37 }
 0x147   : > { %v915_v26 = vpop.permute.xlu1 %914  ;;  %v760_v1 = vpop.permute.xlu0 %759 }
 0x148   : > { %v1073_v60 = vsel %vm1063_vm10, %v1056_v8, %v915_v26  ;;  %v1023_v39 = vsel %vm1012_vm7, %v1006_v55, %v760_v1 }
 0x149   : > { %1673 = vmatmul.mubr.msk.f32.vlgmr.msra.gmra.mrb[0].mxu1 %vm1085_vm11, %v1073_v60 }
 0x14b   : > { %v607_v6 = vpop.permute.xlu1 %606  ;;  %v520_v15 = vpop.permute.xlu0 %519 }
 0x14c   : > { %v974_v19 = vsel %vm961_vm4, %v957_v18, %v607_v6  ;;  %v958_v49 = vsel %vm944_vm3, %v2267_v52, %v520_v15 }
 0x14f   : > { %v810_v33 = vpop.permute.xlu1 %809  ;;  %v762_v23 = vpop.permute.xlu0 %761 }
 0x150   : > { %v1040_v56 = vsel %vm1029_vm8, %v1023_v39, %v810_v33  ;;  %v1024_v24 = vsel %vm1012_vm7, %v1007_v48, %v762_v23 }
 0x153   : > { %v657_v35 = vpop.permute.xlu1 %656  ;;  %v609_v46 = vpop.permute.xlu0 %608 }
 0x154   : > { %v991_v20 = vsel %vm978_vm5, %v974_v19, %v657_v35  ;;  %v975_v37 = vsel %vm961_vm4, %v958_v49, %v609_v46 }
 0x157   : > { %v864_v0 = vpop.permute.xlu1 %863  ;;  %v812_v12 = vpop.permute.xlu0 %811 }
 0x158   : > { %v1057_v50 = vsel %vm1046_vm9, %v1040_v56, %v864_v0  ;;  %v1041_v36 = vsel %vm1029_vm8, %v1024_v24, %v812_v12 }
 0x15b   : > { %v711_v22 = vpop.permute.xlu1 %710  ;;  %v659_v54 = vpop.permute.xlu0 %658 }
 0x15c   : > { %v1008_v30 = vsel %vm995_vm6, %v991_v20, %v711_v22  ;;  %v992_v38 = vsel %vm978_vm5, %v975_v37, %v659_v54 }
 0x15f   : > { %v917_v27 = vpop.permute.xlu1 %916  ;;  %v866_v34 = vpop.permute.xlu0 %865 }
 0x160   : > { %v1074_v61 = vsel %vm1063_vm10, %v1057_v50, %v917_v27  ;;  %v1058_v40 = vsel %vm1046_vm9, %v1041_v36, %v866_v34 }
 0x161   : > { %1675 = vmatprep.mubr.msk.f32.mxu1 %vm1085_vm11, %v1074_v61 }
 0x163   : > { %v713_v16 = vpop.permute.xlu1 %712  ;;  %v522_v62 = vpop.permute.xlu0 %521 }
 0x164   : > { %v1009_v8 = vsel %vm995_vm6, %v992_v38, %v713_v16  ;;  %v959_v35 = vsel %vm944_vm3, %v2334_v43, %v522_v62 }
 0x167   : > { %v919_v42 = vpop.permute.xlu1 %918  ;;  %v764_v4 = vpop.permute.xlu0 %763 }
 0x168   : > { %v1075_v17 = vsel %vm1063_vm10, %v1058_v40, %v919_v42  ;;  %v1025_v31 = vsel %vm1012_vm7, %v1008_v30, %v764_v4 }
 0x169   : > { %1676 = vmatmul.mubr.msk.f32.gmra.mrb[2].mxu1 %vm1085_vm11, %v1075_v17 }
 0x16b   : > { %v611_v3 = vpop.permute.xlu1 %610  ;;  %v524_v63 = vpop.permute.xlu0 %523 }
 0x16c   : > { %v960_v46 = vsel %vm944_vm3, %v2343_v2, %v524_v63  ;;  %v976_v0 = vsel %vm961_vm4, %v959_v35, %v611_v3 }
 0x16f   : > { %v814_v51 = vpop.permute.xlu1 %813  ;;  %v766_v57 = vpop.permute.xlu0 %765 }
 0x170   : > { %v1042_v32 = vsel %vm1029_vm8, %v1025_v31, %v814_v51  ;;  %v1026_v26 = vsel %vm1012_vm7, %v1009_v8, %v766_v57 }
 0x173   : > { %v661_v9 = vpop.permute.xlu1 %660  ;;  %v613_v10 = vpop.permute.xlu0 %612 }
 0x174   : > { %v977_v12 = vsel %vm961_vm4, %v960_v46, %v613_v10  ;;  %v993_v41 = vsel %vm978_vm5, %v976_v0, %v661_v9 }
 0x177   : > { %v868_v11 = vpop.permute.xlu1 %867  ;;  %v816_v7 = vpop.permute.xlu0 %815 }
 0x178   : > { %v1059_v59 = vsel %vm1046_vm9, %v1042_v32, %v868_v11  ;;  %v1043_v1 = vsel %vm1029_vm8, %v1026_v26, %v816_v7 }
 0x17b   : > { %v715_v21 = vpop.permute.xlu1 %714  ;;  %v663_v29 = vpop.permute.xlu0 %662 }
 0x17c   : > { %v994_v53 = vsel %vm978_vm5, %v977_v12, %v663_v29  ;;  %v1010_v54 = vsel %vm995_vm6, %v993_v41, %v715_v21 }
 0x17f   : > { %v921_v58 = vpop.permute.xlu1 %920  ;;  %v870_v5 = vpop.permute.xlu0 %869 }
 0x180   : > { %v1076_v13 = vsel %vm1063_vm10, %v1059_v59, %v921_v58  ;;  %v1060_v60 = vsel %vm1046_vm9, %v1043_v1, %v870_v5 }
 0x181   : > { %1678 = vmatprep.mubr.msk.f32.mxu1 %vm1085_vm11, %v1076_v13 }
 0x183   : > { %v768_v44 = vpop.permute.xlu1 %767  ;;  %v717_v25 = vpop.permute.xlu0 %716 }
 0x184   : > { %v1011_v55 = vsel %vm995_vm6, %v994_v53, %v717_v25  ;;  %v1027_v43 = vsel %vm1012_vm7, %v1010_v54, %v768_v44 }
 0x187   : > { %v770_v6 = vpop.permute.xlu1 %769  ;;  %v923_v33 = vpop.permute.xlu0 %922 }
 0x188   : > { %v1077_v52 = vsel %vm1063_vm10, %v1060_v60, %v923_v33  ;;  %v1028_v39 = vsel %vm1012_vm7, %v1011_v55, %v770_v6 }
 0x189   : > { %1679 = vmatmul.mubr.msk.f32.gmra.mrb[4].mxu1 %vm1085_vm11, %v1077_v52 }
 0x18b   : > { %v820_v15 = vpop.permute.xlu1 %819  ;;  %v818_v23 = vpop.permute.xlu0 %817 }
 0x18c   : > { %v1045_v2 = vsel %vm1029_vm8, %v1028_v39, %v820_v15  ;;  %v1044_v56 = vsel %vm1029_vm8, %v1027_v43, %v818_v23 }
 0x18f   : > { %v874_v45 = vpop.permute.xlu1 %873  ;;  %v872_v22 = vpop.permute.xlu0 %871 }
 0x190   : > { %v1062_v50 = vsel %vm1046_vm9, %v1045_v2, %v874_v45  ;;  %v1061_v27 = vsel %vm1046_vm9, %v1044_v56, %v872_v22 }
 0x193   : > { %v927_v34 = vpop.permute.xlu1 %926  ;;  %v925_v61 = vpop.permute.xlu0 %924 }
 0x194   : > { %v1079_v14 = vsel %vm1063_vm10, %v1062_v50, %v927_v34  ;;  %v1078_v28 = vsel %vm1063_vm10, %v1061_v27, %v925_v61 }
 0x195   : > { %1681 = vmatprep.mubr.msk.f32.mxu1 %vm1085_vm11, %v1078_v28 }
 0x196   : > { %1682 = vmatmul.mubr.msk.f32.gmra.mrb[6].mxu1 %vm1085_vm11, %v1079_v14 }
 0x19d   : > { %v2612_v47 = vpop.f32.mrb[0].mxu0 }
 0x19e   : > { %1362 = vst [vmem:[%s2614_s10 + $0x8] sm:$0xff] %v2612_v47  ;;  %v2618_v16 = vpop.f32.mrb[1].mxu0 }
 0x19f   : > { %v1283_v62 = vadd.f32 %v2612_v47, %v2618_v16  ;;  %1361 = vst [vmem:[%s2614_s10] sm:$0xff] %v2618_v16 }
 0x1bd   : > { %v2624_v48 = vpop.f32.mrb[2].mxu0 }
 0x1be   : > { %1364 = vst [vmem:[%s2614_s10 + $0x18] sm:$0xff] %v2624_v48  ;;  %v2628_v24 = vpop.f32.mrb[3].mxu0 }
 0x1bf   : > { %v1284_v36 = vadd.f32 %v1283_v62, %v2628_v24  ;;  %1363 = vst [vmem:[%s2614_s10 + $0x10] sm:$0xff] %v2628_v24 }
 0x1c1   : > { %v1285_v40 = vadd.f32 %v2624_v48, %v1284_v36 }
 0x1dd   : > { %v2634_v42 = vpop.f32.mrb[4].mxu0 }
 0x1de   : > { %1366 = vst [vmem:[%s2614_s10 + $0x28] sm:$0xff] %v2634_v42  ;;  %v2638_v4 = vpop.f32.mrb[5].mxu0 }
 0x1df   : > { %v1286_v17 = vadd.f32 %v1285_v40, %v2638_v4  ;;  %1365 = vst [vmem:[%s2614_s10 + $0x20] sm:$0xff] %v2638_v4 }
 0x1e1   : > { %v1287_v3 = vadd.f32 %v2634_v42, %v1286_v17 }
 0x1fc   : > { %v2644_v63 = vpop.f32.mrb[6].mxu0 }
 0x1fd   : > { %1368 = vst [vmem:[%s2614_s10 + $0x38] sm:$0xff] %v2644_v63  ;;  %v2648_v51 = vpop.f32.mrb[7].mxu0 }
 0x1fe   : > { %v1288_v57 = vadd.f32 %v1287_v3, %v2648_v51  ;;  %1367 = vst [vmem:[%s2614_s10 + $0x30] sm:$0xff] %v2648_v51 }
 0x200   : > { %v1289_v9 = vadd.f32 %v2644_v63, %v1288_v57 }
 0x21c   : > { %v2654_v10 = vpop.f32.mrb[0].mxu1 }
 0x21d   : > { %1370 = vst [vmem:[%s2614_s10 + $0x48] sm:$0xff] %v2654_v10  ;;  %v2658_v11 = vpop.f32.mrb[1].mxu1 }
 0x21e   : > { %v1290_v7 = vadd.f32 %v1289_v9, %v2658_v11  ;;  %1369 = vst [vmem:[%s2614_s10 + $0x40] sm:$0xff] %v2658_v11 }
 0x220   : > { %v1291_v18 = vadd.f32 %v2654_v10, %v1290_v7 }
 0x23c   : > { %v2664_v19 = vpop.f32.mrb[2].mxu1 }
 0x23d   : > { %1372 = vst [vmem:[%s2614_s10 + $0x58] sm:$0xff] %v2664_v19  ;;  %v2668_v20 = vpop.f32.mrb[3].mxu1 }
 0x23e   : > { %v1292_v21 = vadd.f32 %v1291_v18, %v2668_v20  ;;  %1371 = vst [vmem:[%s2614_s10 + $0x50] sm:$0xff] %v2668_v20 }
 0x240   : > { %v1293_v29 = vadd.f32 %v2664_v19, %v1292_v21 }
 0x25c   : > { %v2674_v30 = vpop.f32.mrb[4].mxu1 }
 0x25d   : > { %1374 = vst [vmem:[%s2614_s10 + $0x68] sm:$0xff] %v2674_v30  ;;  %v2678_v31 = vpop.f32.mrb[5].mxu1 }
 0x25e   : > { %v1294_v32 = vadd.f32 %v1293_v29, %v2678_v31  ;;  %1373 = vst [vmem:[%s2614_s10 + $0x60] sm:$0xff] %v2678_v31 }
 0x260   : > { %v1295_v59 = vadd.f32 %v2674_v30, %v1294_v32 }
 0x269   : > { %v1683_v58 = vpop.f32.mrb[6].mxu1 }
 0x26a   : > { %1376 = vst [vmem:[%s2614_s10 + $0x78] sm:$0xff] %v1683_v58  ;;  %v1274_v5 = vpop.f32.mrb[7].mxu1 }
 0x26b   : > { %v1296_v13 = vadd.f32 %v1295_v59, %v1274_v5  ;;  %1375 = vst [vmem:[%s2614_s10 + $0x70] sm:$0xff] %v1274_v5 }
 0x26c   : > { %1800 = shalt.err (!%p1797_p10)
}
 0x26d   : > { %s1801_s10 = scalar_lea.hbm %s2692_s9, 2048  ;;  %s1805_s12 = scalar_lea.hbm %s2803_s4, 8192 }
 0x26e   : > { %p1802_p11 = scmp.ne.s32.totalorder %s2692_s9, %s1801_s10  ;;  %p1806_p0 = scmp.lt.u32.totalorder %s2692_s9, %s2803_s4 }
 0x26f   : > { %p1807_p1 = scmp.lt.u32.totalorder %s1805_s12, %s1801_s10  ;;  %p1809_p4 = scmp.lt.u32.totalorder %s1801_s10, %s2692_s9 }
 0x270   : > { %p1803_p12 = pnand %p1802_p11, %p2007_p3 }
 0x271   : > { %p1808_p2 = por %p1807_p1, %p1806_p0 }
 0x272   : > { %p1804_p13 = pneg %p1803_p12 }
 0x273   : > { %p1810_p5 = por %p1809_p4, %p1808_p2 }
 0x275   : > { %p1811_p6 = pnand %p1810_p5, %p1804_p13 }
 0x277   : > { %1814 = shalt.err (!%p1811_p6)
}
 0x278   : > { %s1924_s17 = smov 128   ;;  %v1297_v49 = vadd.f32 %v1683_v58, %v1296_v13  ;;  %vm1358_vm12 = vcmask 1040384   ;;  %s1925_s26 = smov [#allocation4]  }
 0x279   : > { %1702 = dma.vmem_to_hbm [thread:$0]  (%p2007_p3), %s2687_s0, 2048, %s2692_s9, %s1378_s16, %s1924_s17, %s1924_s17, %s2826_s27  }
 0x27a   : > { %v1298_v37 = vrot.slane %v1297_v49, 4  ;;  %s1584_s27 = sshll.u32 %s2608_s15, 1  ;;  %s1613_s0 = sshll.u32 %s1901_s22, 1 }
 0x27b   : > { %s1412_s9 = sadd.s32 %s1897_s21, %s1613_s0  ;;  %s347_s13 = scalar_lea.vmem [#allocation4], %s1584_s27 }
 0x27c   : > { %v1299_v38 = vadd.f32 %v1298_v37, %v1297_v49  ;;  %s1614_s16 = sshll.u32 %s1412_s9, 5  ;;  %s1416_s10 = sshll.u32 %s347_s13, 4  ;;  %s2746_s10 = int_to_ptr.vmem [resolvable:$true] %s1416_s10 }
 0x27d   : > { %s2744_s12 = scalar_lea.hbm %s2804_s5, %s1614_s16  ;;  %s1383_s21 = scalar_lea.sflag [#allocation5], %s2608_s15 }
 0x27e   : > { %v1300_v44 = vrot.slane %v1299_v38, 2  ;;  %s1815_s22 = scalar_lea.vmem %s2746_s10, 32  ;;  %s1819_s14 = sshll.u32 %s1925_s26, 4  ;;  %s1820_s14 = int_to_ptr.vmem [resolvable:$false] %s1819_s14 }
 0x27f   : > { %p1816_p7 = scmp.ne.s32.totalorder %s2746_s10, %s1815_s22  ;;  %s1821_s17 = scalar_lea.vmem %s1820_s14, 64 }
 0x280   : > { %v1301_v25 = vadd.f32 %v1300_v44, %v1299_v38  ;;  %p1822_p11 = scmp.lt.s32.totalorder %s2746_s10, %s1820_s14  ;;  %p1823_p12 = scmp.lt.s32.totalorder %s1821_s17, %s1815_s22 }
 0x281   : > { %p1817_p9 = pnand %p1816_p7, %p2007_p3 }
 0x282   : > { %v1302_v8 = vrot.slane %v1301_v25, 1  ;;  %p1824_p13 = por %p1823_p12, %p1822_p11 }
 0x283   : > { %p1818_p10 = pneg %p1817_p9 }
 0x284   : > { %v2721_v26 = vadd.f32 %v1302_v8, %v1301_v25 }
 0x285   : > { %p1825_p0 = pnand %p1824_p13, %p1818_p10 }
 0x286   : > { %v1304_v1 = vmul.f32 0.0078125, %v2721_v26 }
 0x288   : > { %v1305_v60 = vsub.f32 %v2618_v16, %v1304_v1  ;;  %v1306_v6 = vsub.f32 %v2612_v47, %v1304_v1  ;;  %v1307_v33 = vsub.f32 %v2628_v24, %v1304_v1  ;;  %v1308_v52 = vsub.f32 %v2624_v48, %v1304_v1 }
 0x289   : > { %v1309_v15 = vsub.f32 %v2638_v4, %v1304_v1  ;;  %v1310_v23 = vsub.f32 %v2634_v42, %v1304_v1  ;;  %v1311_v35 = vsub.f32 %v2648_v51, %v1304_v1  ;;  %v1312_v46 = vsub.f32 %v2644_v63, %v1304_v1 }
 0x28a   : > { %v1313_v0 = vsub.f32 %v2658_v11, %v1304_v1  ;;  %v1314_v12 = vsub.f32 %v2654_v10, %v1304_v1  ;;  %v1315_v41 = vsub.f32 %v2668_v20, %v1304_v1  ;;  %v1316_v53 = vsub.f32 %v2664_v19, %v1304_v1 }
 0x28b   : > { %v1317_v45 = vsub.f32 %v2678_v31, %v1304_v1  ;;  %v1318_v22 = vsub.f32 %v2674_v30, %v1304_v1  ;;  %v1319_v54 = vsub.f32 %v1274_v5, %v1304_v1  ;;  %v1320_v55 = vsub.f32 %v1683_v58, %v1304_v1 }
 0x28c   : > { %v1321_v43 = vmul.f32 %v1305_v60, %v1305_v60  ;;  %v1322_v39 = vmul.f32 %v1306_v6, %v1306_v6  ;;  %v1323_v2 = vmul.f32 %v1307_v33, %v1307_v33  ;;  %v1324_v50 = vmul.f32 %v1308_v52, %v1308_v52 }
 0x28d   : > { %v1325_v34 = vmul.f32 %v1309_v15, %v1309_v15  ;;  %v1326_v14 = vmul.f32 %v1310_v23, %v1310_v23  ;;  %v1327_v47 = vmul.f32 %v1311_v35, %v1311_v35  ;;  %v1328_v62 = vmul.f32 %v1312_v46, %v1312_v46 }
 0x28e   : > { %v1337_v56 = vadd.f32 %v1322_v39, %v1321_v43  ;;  %v1329_v24 = vmul.f32 %v1313_v0, %v1313_v0  ;;  %v1330_v40 = vmul.f32 %v1314_v12, %v1314_v12  ;;  %v1331_v4 = vmul.f32 %v1315_v41, %v1315_v41 }
 0x28f   : > { %v1332_v3 = vmul.f32 %v1316_v53, %v1316_v53  ;;  %v1333_v51 = vmul.f32 %v1317_v45, %v1317_v45  ;;  %v1334_v9 = vmul.f32 %v1318_v22, %v1318_v22  ;;  %v1335_v11 = vmul.f32 %v1319_v54, %v1319_v54 }
 0x290   : > { %v1338_v27 = vadd.f32 %v1337_v56, %v1323_v2  ;;  %v1336_v18 = vmul.f32 %v1320_v55, %v1320_v55 }
 0x292   : > { %v1339_v61 = vadd.f32 %v1338_v27, %v1324_v50 }
 0x294   : > { %v1340_v28 = vadd.f32 %v1339_v61, %v1325_v34 }
 0x296   : > { %v1341_v16 = vadd.f32 %v1340_v28, %v1326_v14 }
 0x298   : > { %v1342_v48 = vadd.f32 %v1341_v16, %v1327_v47 }
 0x29a   : > { %v1343_v36 = vadd.f32 %v1342_v48, %v1328_v62 }
 0x29c   : > { %v1344_v42 = vadd.f32 %v1343_v36, %v1329_v24 }
 0x29e   : > { %v1345_v17 = vadd.f32 %v1344_v42, %v1330_v40 }
 0x2a0   : > { %v1346_v63 = vadd.f32 %v1345_v17, %v1331_v4 }
 0x2a2   : > { %v1347_v57 = vadd.f32 %v1346_v63, %v1332_v3 }
 0x2a4   : > { %v1348_v10 = vadd.f32 %v1347_v57, %v1333_v51 }
 0x2a6   : > { %v1349_v7 = vadd.f32 %v1348_v10, %v1334_v9 }
 0x2a8   : > { %v1350_v19 = vadd.f32 %v1349_v7, %v1335_v11 }
 0x2aa   : > { %v1351_v20 = vadd.f32 %v1350_v19, %v1336_v18 }
 0x2ac   : > { %v1352_v21 = vrot.slane %v1351_v20, 4 }
 0x2ae   : > { %v1353_v29 = vadd.f32 %v1352_v21, %v1351_v20 }
 0x2b0   : > { %v1354_v30 = vrot.slane %v1353_v29, 2 }
 0x2b2   : > { %v1355_v31 = vadd.f32 %v1354_v30, %v1353_v29 }
 0x2b4   : > { %v1356_v32 = vrot.slane %v1355_v31, 1 }
 0x2b6   : > { %v1357_v59 = vadd.f32 %v1356_v32, %v1355_v31 }
 0x2b8   : > { %v1359_v58 = vsel %vm1358_vm12, %v2721_v26, %v1357_v59 }
 0x2b9   : > { %1360 = vst [vmem:[%s347_s13] sm:$0x3] %v1359_v58 }
 0x2ba   : > { %1828 = shalt.err (!%p1825_p0)
}
 0x2bb   : > { %s1829_s15 = scalar_lea.hbm %s2744_s12, 32  ;;  %s1833_s9 = scalar_lea.hbm %s2804_s5, 128 }
 0x2bc   : > { %p1830_p1 = scmp.ne.s32.totalorder %s2744_s12, %s1829_s15  ;;  %p1834_p5 = scmp.lt.u32.totalorder %s2744_s12, %s2804_s5 }
 0x2bd   : > { %p1835_p6 = scmp.lt.u32.totalorder %s1833_s9, %s1829_s15  ;;  %p1837_p9 = scmp.lt.u32.totalorder %s1829_s15, %s2744_s12 }
 0x2be   : > { %p1831_p2 = pnand %p1830_p1, %p2007_p3 }
 0x2bf   : > { %p1836_p7 = por %p1835_p6, %p1834_p5 }
 0x2c0   : > { %p1832_p4 = pneg %p1831_p2 }
 0x2c1   : > { %p1838_p10 = por %p1837_p9, %p1836_p7 }
 0x2c3   : > { %p1839_p11 = pnand %p1838_p10, %p1832_p4 }
 0x2c5   : > { %1842 = shalt.err (!%p1839_p11)
}
 0x2c6   : > { %1703 = dma.vmem_to_hbm [thread:$0]  (%p2007_p3), %s2746_s10, 32, %s2744_s12, %s1383_s21  }
 0x2c7 PF: > { %p1713_p12 = scmp.ge.s32.totalorder %s1913_s25, 2  ;;  %s1428_s30 = sand.u32 1, %s1885_s18  }
 0x2c8   : > { %s1429_s8 = scalar_lea.sflag [#allocation3], %s1428_s30 }
 0x2c9   : > { %p1707_p13 = pnand %p1713_p12, %p2016_p8 }
 0x2cb   : > { %1876 = dma.done.wait (!%p1707_p13), %s1429_s8, 2048  }
 0x2cc   : > { %1878 = vsyncadd (!%p1707_p13), %s1429_s8, 4294965248  ;;  %s1438_s22 = scalar_lea.sflag [#allocation5], %s1428_s30 }
 0x2cd   : > { %1880 = dma.done.wait (!%p1707_p13), %s1438_s22, 32  }
 0x2ce   : > { %1882 = vsyncadd (!%p1707_p13), %s1438_s22, 4294967264  ;;  %s22_s25 = sadd.s32 1, %s1913_s25   ;;  %s2830_s18 = smov %s1889_s19 }
 0x2cf   : > { %p19_p0 = scmp.ge.s32.totalorder %s22_s25, 6   ;;  %s2831_s19 = smov %s1893_s20 }
 0x2d0   : > { %s2832_s20 = smov %s2025_s11  ;;  %s2833_s21 = smov %s1905_s23 }
 0x2d1   : > { %s2834_s22 = smov %s1909_s24  ;;  %s2835_s23 = smov %s2838_s28 }
 0x2d2   : > { %s2836_s24 = smov %s2842_s29  ;;  %21 = sbr.rel (!%p19_p0) target bundleno = 9 (0x9), region = 94 }
 0x2d9   :  { %1443 = vsyncpa [#allocation3], 1 }
 0x2da   :  { %1445 = vsyncpa [#allocation3 + $0x1], 1 }
 0x2db   :  { %1446 = vsyncpa [#allocation5], 1 }
 0x2dc   :  { %1448 = vsyncpa [#allocation5 + $0x1], 1 }

</bundles_post_ra>
